<compile_context>
chip_gen: v5e
topology: v5e:2x2
jax: 0.10.0
libtpu: 0.0.40
codegen_flags: <defaults>
</compile_context>

<pallas_src>
import jax
import jax.numpy as jnp
from jax import lax
from jax.experimental import pallas as pl
from jax.experimental.pallas import tpu as pltpu


def _bottleneck_kernel(x_ref, w1_ref, s1_ref, b1_ref,
                       w2_ref, s2_ref, b2_ref,
                       w3_ref, s3_ref, b3_ref,
                       o_ref):
    # x_ref: (1, H, W, Cin) f32 ; o_ref: (1, H, W, Cout) f32 ; Cin == Cout here.
    _, H, W, Cin = x_ref.shape
    Cm = w2_ref.shape[1]
    Cout = w3_ref.shape[1]

    x = x_ref[0]                                    # (H, W, Cin) f32
    xr = x.reshape(H * W, Cin)

    # ---- conv1 (1x1) + bn1 + relu : (H*W, Cin) @ (Cin, Cm) on the MXU ----
    y1 = jnp.dot(xr.astype(jnp.bfloat16), w1_ref[...],
                 preferred_element_type=jnp.float32)
    y1 = jnp.maximum(y1 * s1_ref[...] + b1_ref[...], 0.0)      # f32
    y1 = y1.reshape(H, W, Cm)

    # ---- conv2 (3x3, stride 1, pad 1) + bn2 + relu ----
    # Build the 9 shifted taps in registers and stack them along K so the
    # whole 3x3 conv is a single deep matmul: (H*W, 9*Cm) @ (9*Cm, Cm).
    #   dx shift: pltpu.roll along W (sublane rotate, XLU slot) + edge mask.
    #   dy shift: slice/concat along the leading H dim (cheap vreg selection).
    col = lax.broadcasted_iota(jnp.int32, (H, W, Cm), 1)
    shifted_w = {}
    for ox in (-1, 0, 1):
        if ox == 0:
            shifted_w[ox] = y1
        else:
            rolled = pltpu.roll(y1, shift=(-ox) % W, axis=1)
            valid = jnp.logical_and(col + ox >= 0, col + ox < W)
            shifted_w[ox] = jnp.where(valid, rolled, 0.0)

    taps = []
    for oy in (-1, 0, 1):
        for ox in (-1, 0, 1):
            a = shifted_w[ox]
            if oy > 0:
                a = jnp.concatenate(
                    [a[oy:], jnp.zeros((oy, W, Cm), a.dtype)], axis=0)
            elif oy < 0:
                a = jnp.concatenate(
                    [jnp.zeros((-oy, W, Cm), a.dtype), a[:H + oy]], axis=0)
            taps.append(a)
    patches = jnp.concatenate(taps, axis=-1).reshape(H * W, 9 * Cm)

    y2 = jnp.dot(patches.astype(jnp.bfloat16), w2_ref[...],
                 preferred_element_type=jnp.float32)
    y2 = jnp.maximum(y2 * s2_ref[...] + b2_ref[...], 0.0)      # (H*W, Cm) f32

    # ---- conv3 (1x1) + bn3 + identity add + relu ----
    z = jnp.dot(y2.astype(jnp.bfloat16), w3_ref[...],
                preferred_element_type=jnp.float32)
    z = z * s3_ref[...] + b3_ref[...] + xr                     # identity in f32
    o_ref[0] = jnp.maximum(z, 0.0).reshape(H, W, Cout)


def bottleneck_block(x_nchw, w1, s1, b1, w2, s2, b2, w3, s3, b3):
    """x_nchw: (N, Cin, H, W) f32.  w1:(Cin,Cm), w2:(3,3,Cm,Cm), w3:(Cm,Cout)."""
    N, Cin, H, W = x_nchw.shape
    Cm = w1.shape[1]
    Cout = w3.shape[1]
    # Identity path requires stride=1 and Cin == Cout (no identity_downsample).
    assert Cin == Cout, "bottleneck identity add requires in_channels == out_channels*expansion"

    x = jnp.transpose(x_nchw, (0, 2, 3, 1))         # NHWC for the kernel

    # bf16 matmul weights (f32 accumulation happens in the kernel).
    w1b = w1.astype(jnp.bfloat16)                   # (Cin, Cm)
    w2b = w2.reshape(9 * Cm, Cm).astype(jnp.bfloat16)   # taps stacked along K
    w3b = w3.astype(jnp.bfloat16)                   # (Cm, Cout)

    # per-channel scale/bias as (1, C) rows so they broadcast against (H*W, C)
    s1r, b1r = s1.reshape(1, Cm), b1.reshape(1, Cm)
    s2r, b2r = s2.reshape(1, Cm), b2.reshape(1, Cm)
    s3r, b3r = s3.reshape(1, Cout), b3.reshape(1, Cout)

    full = lambda a: pl.BlockSpec(a.shape, lambda n: (0,) * a.ndim)

    out = pl.pallas_call(
        _bottleneck_kernel,
        out_shape=jax.ShapeDtypeStruct((N, H, W, Cout), jnp.float32),
        grid_spec=pltpu.PrefetchScalarGridSpec(
            num_scalar_prefetch=0,
            grid=(N,),
            in_specs=[
                pl.BlockSpec((1, H, W, Cin), lambda n: (n, 0, 0, 0)),
                full(w1b), full(s1r), full(b1r),
                full(w2b), full(s2r), full(b2r),
                full(w3b), full(s3r), full(b3r),
            ],
            out_specs=pl.BlockSpec((1, H, W, Cout), lambda n: (n, 0, 0, 0)),
        ),
        compiler_params=pltpu.CompilerParams(
            dimension_semantics=("parallel",),
            vmem_limit_bytes=64 * 1024 * 1024),
    )(x, w1b, s1r, b1r, w2b, s2r, b2r, w3b, s3r, b3r)

    return jnp.transpose(out, (0, 3, 1, 2))         # back to NCHW


def _bn_fold(gamma, beta, mean, var, eps=1e-5):
    scale = gamma / jnp.sqrt(var + eps)
    bias = beta - mean * scale
    return scale, bias


def _reference(x, w1_oihw, w2_oihw, w3_oihw, bn1, bn2, bn3):
    dn = ("NCHW", "OIHW", "NCHW")
    relu = lambda a: jnp.maximum(a, 0.0)

    def bn(a, params):
        s, b = _bn_fold(*params)
        return a * s[None, :, None, None] + b[None, :, None, None]

    y = lax.conv_general_dilated(x, w1_oihw, (1, 1), "VALID",
                                 dimension_numbers=dn)
    y = relu(bn(y, bn1))
    y = lax.conv_general_dilated(y, w2_oihw, (1, 1), ((1, 1), (1, 1)),
                                 dimension_numbers=dn)
    y = relu(bn(y, bn2))
    y = lax.conv_general_dilated(y, w3_oihw, (1, 1), "VALID",
                                 dimension_numbers=dn)
    y = bn(y, bn3) + x
    return relu(y)


if __name__ == "__main__":
    expansion = 4
    N, out_channels, H, W = 2, 4, 16, 16
    in_channels = out_channels * expansion          # 16, so identity add is valid
    Cm = out_channels
    Cout = out_channels * expansion

    key = jax.random.PRNGKey(0)
    ks = jax.random.split(key, 16)

    x = jax.random.normal(ks[0], (N, in_channels, H, W), jnp.float32)

    # PyTorch-shaped conv weights (OIHW), bias=False
    w1_oihw = 0.1 * jax.random.normal(ks[1], (Cm, in_channels, 1, 1), jnp.float32)
    w2_oihw = 0.1 * jax.random.normal(ks[2], (Cm, Cm, 3, 3), jnp.float32)
    w3_oihw = 0.1 * jax.random.normal(ks[3], (Cout, Cm, 1, 1), jnp.float32)

    def bn_params(k, c):
        k1, k2, k3, k4 = jax.random.split(k, 4)
        gamma = 1.0 + 0.1 * jax.random.normal(k1, (c,), jnp.float32)
        beta = 0.1 * jax.random.normal(k2, (c,), jnp.float32)
        mean = 0.1 * jax.random.normal(k3, (c,), jnp.float32)
        var = jax.random.uniform(k4, (c,), jnp.float32, 0.5, 1.5)
        return gamma, beta, mean, var

    bn1 = bn_params(ks[4], Cm)
    bn2 = bn_params(ks[5], Cm)
    bn3 = bn_params(ks[6], Cout)

    # matmul-form weights for the kernel
    w1 = jnp.transpose(w1_oihw[:, :, 0, 0], (1, 0))          # (Cin, Cm)
    w2 = jnp.transpose(w2_oihw, (2, 3, 1, 0))                # (3, 3, Cm, Cm) = (dy, dx, cin, cout)
    w3 = jnp.transpose(w3_oihw[:, :, 0, 0], (1, 0))          # (Cm, Cout)
    s1, b1 = _bn_fold(*bn1)
    s2, b2 = _bn_fold(*bn2)
    s3, b3 = _bn_fold(*bn3)

    out = bottleneck_block(x, w1, s1, b1, w2, s2, b2, w3, s3, b3)
    out = jax.block_until_ready(out)

    ref = _reference(x, w1_oihw, w2_oihw, w3_oihw, bn1, bn2, bn3)
    assert out.shape == (N, Cout, H, W)
    # bf16 MXU inputs with f32 accumulation -> bf16-level tolerance vs f32 ref.
    assert jnp.allclose(out, ref, atol=2e-2, rtol=2e-2), "mismatch vs reference"

    print("KERNEL_OK")
</pallas_src>

<mosaic_0001>
module attributes {stable_mosaic.version = 11 : i64} {
  func.func @_bottleneck_kernel(%arg0: i32, %arg1: memref<1x16x16x16xf32, #tpu.memory_space<vmem>>, %arg2: memref<16x4xbf16, #tpu.memory_space<vmem>>, %arg3: memref<1x4xf32, #tpu.memory_space<vmem>>, %arg4: memref<1x4xf32, #tpu.memory_space<vmem>>, %arg5: memref<36x4xbf16, #tpu.memory_space<vmem>>, %arg6: memref<1x4xf32, #tpu.memory_space<vmem>>, %arg7: memref<1x4xf32, #tpu.memory_space<vmem>>, %arg8: memref<4x16xbf16, #tpu.memory_space<vmem>>, %arg9: memref<1x16xf32, #tpu.memory_space<vmem>>, %arg10: memref<1x16xf32, #tpu.memory_space<vmem>>, %arg11: memref<1x16x16x16xf32, #tpu.memory_space<vmem>>) attributes {dimension_semantics = [#tpu.dimension_semantics<parallel>], iteration_bounds = array<i64: 2>, scalar_prefetch = 0 : i64, scratch_operands = 0 : i64, tpu.core_type = #tpu.core_type<tc>, window_params = [{transform_indices = @transform_0, window_bounds = array<i64: 1, 16, 16, 16>}, {pipeline_mode = #tpu.pipeline_mode<synchronous>, transform_indices = @transform_1, window_bounds = array<i64: 16, 4>}, {pipeline_mode = #tpu.pipeline_mode<synchronous>, transform_indices = @transform_2, window_bounds = array<i64: 1, 4>}, {pipeline_mode = #tpu.pipeline_mode<synchronous>, transform_indices = @transform_3, window_bounds = array<i64: 1, 4>}, {pipeline_mode = #tpu.pipeline_mode<synchronous>, transform_indices = @transform_4, window_bounds = array<i64: 36, 4>}, {pipeline_mode = #tpu.pipeline_mode<synchronous>, transform_indices = @transform_5, window_bounds = array<i64: 1, 4>}, {pipeline_mode = #tpu.pipeline_mode<synchronous>, transform_indices = @transform_6, window_bounds = array<i64: 1, 4>}, {pipeline_mode = #tpu.pipeline_mode<synchronous>, transform_indices = @transform_7, window_bounds = array<i64: 4, 16>}, {pipeline_mode = #tpu.pipeline_mode<synchronous>, transform_indices = @transform_8, window_bounds = array<i64: 1, 16>}, {pipeline_mode = #tpu.pipeline_mode<synchronous>, transform_indices = @transform_9, window_bounds = array<i64: 1, 16>}, {transform_indices = @transform_10, window_bounds = array<i64: 1, 16, 16, 16>}]} {
    %c0 = arith.constant 0 : index
    %c0_0 = arith.constant 0 : index
    %c0_1 = arith.constant 0 : index
    %c0_2 = arith.constant 0 : index
    %0 = vector.load %arg1[%c0, %c0_0, %c0_1, %c0_2] : memref<1x16x16x16xf32, #tpu.memory_space<vmem>>, vector<1x16x16x16xf32>
    %1 = vector.shape_cast %0 : vector<1x16x16x16xf32> to vector<16x16x16xf32>
    %2 = vector.shape_cast %1 : vector<16x16x16xf32> to vector<256x16xf32>
    %3 = arith.truncf %2 : vector<256x16xf32> to vector<256x16xbf16>
    %c0_3 = arith.constant 0 : index
    %c0_4 = arith.constant 0 : index
    %4 = vector.load %arg2[%c0_3, %c0_4] : memref<16x4xbf16, #tpu.memory_space<vmem>>, vector<16x4xbf16>
    %cst = arith.constant dense<0.000000e+00> : vector<256x4xf32>
    %5 = tpu.matmul %3, %4, %cst {dimension_numbers = #tpu.dot_dimension_numbers<[1], [0], [0], [1], [0, 0, 1, 1], [], []>} : vector<256x16xbf16>, vector<16x4xbf16>, vector<256x4xf32> -> vector<256x4xf32>
    %c0_5 = arith.constant 0 : index
    %c0_6 = arith.constant 0 : index
    %6 = vector.load %arg3[%c0_5, %c0_6] : memref<1x4xf32, #tpu.memory_space<vmem>>, vector<1x4xf32>
    %7 = vector.broadcast %6 : vector<1x4xf32> to vector<256x4xf32>
    %8 = arith.mulf %5, %7 : vector<256x4xf32>
    %c0_7 = arith.constant 0 : index
    %c0_8 = arith.constant 0 : index
    %9 = vector.load %arg4[%c0_7, %c0_8] : memref<1x4xf32, #tpu.memory_space<vmem>>, vector<1x4xf32>
    %10 = vector.broadcast %9 : vector<1x4xf32> to vector<256x4xf32>
    %11 = arith.addf %8, %10 : vector<256x4xf32>
    %cst_9 = arith.constant 0.000000e+00 : f32
    %12 = vector.broadcast %cst_9 : f32 to vector<256x4xf32>
    %13 = arith.maximumf %11, %12 : vector<256x4xf32>
    %14 = vector.shape_cast %13 : vector<256x4xf32> to vector<16x16x4xf32>
    %15 = tpu.iota {dimensions = array<i32: 1>} : vector<16x16x4xi32>
    %c1_i32 = arith.constant 1 : i32
    %16 = tpu.dynamic_rotate %14 by %c1_i32 dim 1 : vector<16x16x4xf32>, i32 -> vector<16x16x4xf32>
    %c-1_i32 = arith.constant -1 : i32
    %17 = vector.broadcast %c-1_i32 : i32 to vector<16x16x4xi32>
    %18 = arith.addi %15, %17 : vector<16x16x4xi32>
    %c0_i32 = arith.constant 0 : i32
    %19 = vector.broadcast %c0_i32 : i32 to vector<16x16x4xi32>
    %20 = arith.cmpi sge, %18, %19 : vector<16x16x4xi32>
    %c-1_i32_10 = arith.constant -1 : i32
    %21 = vector.broadcast %c-1_i32_10 : i32 to vector<16x16x4xi32>
    %22 = arith.addi %15, %21 : vector<16x16x4xi32>
    %c16_i32 = arith.constant 16 : i32
    %23 = vector.broadcast %c16_i32 : i32 to vector<16x16x4xi32>
    %24 = arith.cmpi slt, %22, %23 : vector<16x16x4xi32>
    %25 = arith.andi %20, %24 : vector<16x16x4xi1>
    %cst_11 = arith.constant 0.000000e+00 : f32
    %26 = vector.broadcast %cst_11 : f32 to vector<16x16x4xf32>
    %27 = arith.select %25, %16, %26 : vector<16x16x4xi1>, vector<16x16x4xf32>
    %c15_i32 = arith.constant 15 : i32
    %28 = tpu.dynamic_rotate %14 by %c15_i32 dim 1 : vector<16x16x4xf32>, i32 -> vector<16x16x4xf32>
    %c1_i32_12 = arith.constant 1 : i32
    %29 = vector.broadcast %c1_i32_12 : i32 to vector<16x16x4xi32>
    %30 = arith.addi %15, %29 : vector<16x16x4xi32>
    %c0_i32_13 = arith.constant 0 : i32
    %31 = vector.broadcast %c0_i32_13 : i32 to vector<16x16x4xi32>
    %32 = arith.cmpi sge, %30, %31 : vector<16x16x4xi32>
    %c1_i32_14 = arith.constant 1 : i32
    %33 = vector.broadcast %c1_i32_14 : i32 to vector<16x16x4xi32>
    %34 = arith.addi %15, %33 : vector<16x16x4xi32>
    %c16_i32_15 = arith.constant 16 : i32
    %35 = vector.broadcast %c16_i32_15 : i32 to vector<16x16x4xi32>
    %36 = arith.cmpi slt, %34, %35 : vector<16x16x4xi32>
    %37 = arith.andi %32, %36 : vector<16x16x4xi1>
    %cst_16 = arith.constant 0.000000e+00 : f32
    %38 = vector.broadcast %cst_16 : f32 to vector<16x16x4xf32>
    %39 = arith.select %37, %28, %38 : vector<16x16x4xi1>, vector<16x16x4xf32>
    %cst_17 = arith.constant 0.000000e+00 : f32
    %40 = vector.broadcast %cst_17 : f32 to vector<1x16x4xf32>
    %41 = vector.extract_strided_slice %27 {offsets = [0, 0, 0], sizes = [15, 16, 4], strides = [1, 1, 1]} : vector<16x16x4xf32> to vector<15x16x4xf32>
    %42 = tpu.concatenate %40, %41 in 0 : vector<1x16x4xf32>, vector<15x16x4xf32> -> vector<16x16x4xf32>
    %cst_18 = arith.constant 0.000000e+00 : f32
    %43 = vector.broadcast %cst_18 : f32 to vector<1x16x4xf32>
    %44 = vector.extract_strided_slice %14 {offsets = [0, 0, 0], sizes = [15, 16, 4], strides = [1, 1, 1]} : vector<16x16x4xf32> to vector<15x16x4xf32>
    %45 = tpu.concatenate %43, %44 in 0 : vector<1x16x4xf32>, vector<15x16x4xf32> -> vector<16x16x4xf32>
    %cst_19 = arith.constant 0.000000e+00 : f32
    %46 = vector.broadcast %cst_19 : f32 to vector<1x16x4xf32>
    %47 = vector.extract_strided_slice %39 {offsets = [0, 0, 0], sizes = [15, 16, 4], strides = [1, 1, 1]} : vector<16x16x4xf32> to vector<15x16x4xf32>
    %48 = tpu.concatenate %46, %47 in 0 : vector<1x16x4xf32>, vector<15x16x4xf32> -> vector<16x16x4xf32>
    %49 = vector.extract_strided_slice %27 {offsets = [1, 0, 0], sizes = [15, 16, 4], strides = [1, 1, 1]} : vector<16x16x4xf32> to vector<15x16x4xf32>
    %cst_20 = arith.constant 0.000000e+00 : f32
    %50 = vector.broadcast %cst_20 : f32 to vector<1x16x4xf32>
    %51 = tpu.concatenate %49, %50 in 0 : vector<15x16x4xf32>, vector<1x16x4xf32> -> vector<16x16x4xf32>
    %52 = vector.extract_strided_slice %14 {offsets = [1, 0, 0], sizes = [15, 16, 4], strides = [1, 1, 1]} : vector<16x16x4xf32> to vector<15x16x4xf32>
    %cst_21 = arith.constant 0.000000e+00 : f32
    %53 = vector.broadcast %cst_21 : f32 to vector<1x16x4xf32>
    %54 = tpu.concatenate %52, %53 in 0 : vector<15x16x4xf32>, vector<1x16x4xf32> -> vector<16x16x4xf32>
    %55 = vector.extract_strided_slice %39 {offsets = [1, 0, 0], sizes = [15, 16, 4], strides = [1, 1, 1]} : vector<16x16x4xf32> to vector<15x16x4xf32>
    %cst_22 = arith.constant 0.000000e+00 : f32
    %56 = vector.broadcast %cst_22 : f32 to vector<1x16x4xf32>
    %57 = tpu.concatenate %55, %56 in 0 : vector<15x16x4xf32>, vector<1x16x4xf32> -> vector<16x16x4xf32>
    %58 = tpu.concatenate %42, %45, %48, %27, %14, %39, %51, %54, %57 in 2 : vector<16x16x4xf32>, vector<16x16x4xf32>, vector<16x16x4xf32>, vector<16x16x4xf32>, vector<16x16x4xf32>, vector<16x16x4xf32>, vector<16x16x4xf32>, vector<16x16x4xf32>, vector<16x16x4xf32> -> vector<16x16x36xf32>
    %59 = vector.shape_cast %58 : vector<16x16x36xf32> to vector<256x36xf32>
    %60 = arith.truncf %59 : vector<256x36xf32> to vector<256x36xbf16>
    %c0_23 = arith.constant 0 : index
    %c0_24 = arith.constant 0 : index
    %61 = vector.load %arg5[%c0_23, %c0_24] : memref<36x4xbf16, #tpu.memory_space<vmem>>, vector<36x4xbf16>
    %cst_25 = arith.constant dense<0.000000e+00> : vector<256x4xf32>
    %62 = tpu.matmul %60, %61, %cst_25 {dimension_numbers = #tpu.dot_dimension_numbers<[1], [0], [0], [1], [0, 0, 1, 1], [], []>} : vector<256x36xbf16>, vector<36x4xbf16>, vector<256x4xf32> -> vector<256x4xf32>
    %c0_26 = arith.constant 0 : index
    %c0_27 = arith.constant 0 : index
    %63 = vector.load %arg6[%c0_26, %c0_27] : memref<1x4xf32, #tpu.memory_space<vmem>>, vector<1x4xf32>
    %64 = vector.broadcast %63 : vector<1x4xf32> to vector<256x4xf32>
    %65 = arith.mulf %62, %64 : vector<256x4xf32>
    %c0_28 = arith.constant 0 : index
    %c0_29 = arith.constant 0 : index
    %66 = vector.load %arg7[%c0_28, %c0_29] : memref<1x4xf32, #tpu.memory_space<vmem>>, vector<1x4xf32>
    %67 = vector.broadcast %66 : vector<1x4xf32> to vector<256x4xf32>
    %68 = arith.addf %65, %67 : vector<256x4xf32>
    %cst_30 = arith.constant 0.000000e+00 : f32
    %69 = vector.broadcast %cst_30 : f32 to vector<256x4xf32>
    %70 = arith.maximumf %68, %69 : vector<256x4xf32>
    %71 = arith.truncf %70 : vector<256x4xf32> to vector<256x4xbf16>
    %c0_31 = arith.constant 0 : index
    %c0_32 = arith.constant 0 : index
    %72 = vector.load %arg8[%c0_31, %c0_32] : memref<4x16xbf16, #tpu.memory_space<vmem>>, vector<4x16xbf16>
    %cst_33 = arith.constant dense<0.000000e+00> : vector<256x16xf32>
    %73 = tpu.matmul %71, %72, %cst_33 {dimension_numbers = #tpu.dot_dimension_numbers<[1], [0], [0], [1], [0, 0, 1, 1], [], []>} : vector<256x4xbf16>, vector<4x16xbf16>, vector<256x16xf32> -> vector<256x16xf32>
    %c0_34 = arith.constant 0 : index
    %c0_35 = arith.constant 0 : index
    %74 = vector.load %arg9[%c0_34, %c0_35] : memref<1x16xf32, #tpu.memory_space<vmem>>, vector<1x16xf32>
    %75 = vector.broadcast %74 : vector<1x16xf32> to vector<256x16xf32>
    %76 = arith.mulf %73, %75 : vector<256x16xf32>
    %c0_36 = arith.constant 0 : index
    %c0_37 = arith.constant 0 : index
    %77 = vector.load %arg10[%c0_36, %c0_37] : memref<1x16xf32, #tpu.memory_space<vmem>>, vector<1x16xf32>
    %78 = vector.broadcast %77 : vector<1x16xf32> to vector<256x16xf32>
    %79 = arith.addf %76, %78 : vector<256x16xf32>
    %80 = arith.addf %79, %2 : vector<256x16xf32>
    %cst_38 = arith.constant 0.000000e+00 : f32
    %81 = vector.broadcast %cst_38 : f32 to vector<256x16xf32>
    %82 = arith.maximumf %80, %81 : vector<256x16xf32>
    %83 = vector.shape_cast %82 : vector<256x16xf32> to vector<16x16x16xf32>
    %c0_39 = arith.constant 0 : index
    %c0_40 = arith.constant 0 : index
    %c0_41 = arith.constant 0 : index
    %c0_42 = arith.constant 0 : index
    %84 = vector.load %arg11[%c0_39, %c0_40, %c0_41, %c0_42] : memref<1x16x16x16xf32, #tpu.memory_space<vmem>>, vector<1x16x16x16xf32>
    %85 = vector.shape_cast %84 : vector<1x16x16x16xf32> to vector<16x16x16xf32>
    %86 = vector.shape_cast %83 : vector<16x16x16xf32> to vector<1x16x16x16xf32>
    tpu.vector_store %arg11[%c0_39, %c0_40, %c0_41, %c0_42], %86 {strides = array<i32>} : memref<1x16x16x16xf32, #tpu.memory_space<vmem>>, vector<1x16x16x16xf32>,
    return
  }
  func.func @transform_0(%arg0: i32) -> (i32, i32, i32, i32) {
    %c0_i32 = arith.constant 0 : i32
    %c0_i32_0 = arith.constant 0 : i32
    %c0_i32_1 = arith.constant 0 : i32
    %c0_i32_2 = arith.constant 0 : i32
    return %arg0, %c0_i32, %c0_i32_0, %c0_i32_1 : i32, i32, i32, i32
  }
  func.func @transform_1(%arg0: i32) -> (i32, i32) {
    %c0_i32 = arith.constant 0 : i32
    %c0_i32_0 = arith.constant 0 : i32
    %c0_i32_1 = arith.constant 0 : i32
    return %c0_i32, %c0_i32_0 : i32, i32
  }
  func.func @transform_2(%arg0: i32) -> (i32, i32) {
    %c0_i32 = arith.constant 0 : i32
    %c0_i32_0 = arith.constant 0 : i32
    %c0_i32_1 = arith.constant 0 : i32
    return %c0_i32, %c0_i32_0 : i32, i32
  }
  func.func @transform_3(%arg0: i32) -> (i32, i32) {
    %c0_i32 = arith.constant 0 : i32
    %c0_i32_0 = arith.constant 0 : i32
    %c0_i32_1 = arith.constant 0 : i32
    return %c0_i32, %c0_i32_0 : i32, i32
  }
  func.func @transform_4(%arg0: i32) -> (i32, i32) {
    %c0_i32 = arith.constant 0 : i32
    %c0_i32_0 = arith.constant 0 : i32
    %c0_i32_1 = arith.constant 0 : i32
    return %c0_i32, %c0_i32_0 : i32, i32
  }
  func.func @transform_5(%arg0: i32) -> (i32, i32) {
    %c0_i32 = arith.constant 0 : i32
    %c0_i32_0 = arith.constant 0 : i32
    %c0_i32_1 = arith.constant 0 : i32
    return %c0_i32, %c0_i32_0 : i32, i32
  }
  func.func @transform_6(%arg0: i32) -> (i32, i32) {
    %c0_i32 = arith.constant 0 : i32
    %c0_i32_0 = arith.constant 0 : i32
    %c0_i32_1 = arith.constant 0 : i32
    return %c0_i32, %c0_i32_0 : i32, i32
  }
  func.func @transform_7(%arg0: i32) -> (i32, i32) {
    %c0_i32 = arith.constant 0 : i32
    %c0_i32_0 = arith.constant 0 : i32
    %c0_i32_1 = arith.constant 0 : i32
    return %c0_i32, %c0_i32_0 : i32, i32
  }
  func.func @transform_8(%arg0: i32) -> (i32, i32) {
    %c0_i32 = arith.constant 0 : i32
    %c0_i32_0 = arith.constant 0 : i32
    %c0_i32_1 = arith.constant 0 : i32
    return %c0_i32, %c0_i32_0 : i32, i32
  }
  func.func @transform_9(%arg0: i32) -> (i32, i32) {
    %c0_i32 = arith.constant 0 : i32
    %c0_i32_0 = arith.constant 0 : i32
    %c0_i32_1 = arith.constant 0 : i32
    return %c0_i32, %c0_i32_0 : i32, i32
  }
  func.func @transform_10(%arg0: i32) -> (i32, i32, i32, i32) {
    %c0_i32 = arith.constant 0 : i32
    %c0_i32_0 = arith.constant 0 : i32
    %c0_i32_1 = arith.constant 0 : i32
    %c0_i32_2 = arith.constant 0 : i32
    return %arg0, %c0_i32, %c0_i32_0, %c0_i32_1 : i32, i32, i32, i32
  }
}

</mosaic_0001>

<bundles_post_ra>
// kernel: tpu_custom_call.1
= control target key start
LH: loop header
LB: loop body
LE: loop exit
PB: predicated region body
PF: predicated region fallthrough
CT: control target
= control target key end

     0   :  { %15 = vsyncpa [#allocation3], 0  ;;  %s5529_s0 = inlined_call_operand.hbm [shape: f32[2,16,16,16], index: 0, kind: input, shape index: {}]   ;;  %s5530_s1 = inlined_call_operand.vmem [shape: bf16[16,4], index: 1, kind: input, shape index: {}]   ;;  %s5531_s2 = inlined_call_operand.vmem [shape: f32[1,4], index: 2, kind: input, shape index: {}]   ;;  %s5532_s3 = inlined_call_operand.vmem [shape: f32[1,4], index: 3, kind: input, shape index: {}]   ;;  %s5533_s4 = inlined_call_operand.vmem [shape: bf16[36,4], index: 4, kind: input, shape index: {}]   ;;  %s5534_s5 = inlined_call_operand.vmem [shape: f32[1,4], index: 5, kind: input, shape index: {}]   ;;  %s5535_s6 = inlined_call_operand.vmem [shape: f32[1,4], index: 6, kind: input, shape index: {}]   ;;  %s5536_s7 = inlined_call_operand.vmem [shape: bf16[4,16], index: 7, kind: input, shape index: {}]   ;;  %s5537_s8 = inlined_call_operand.vmem [shape: f32[1,16], index: 8, kind: input, shape index: {}]   ;;  %s5538_s9 = inlined_call_operand.vmem [shape: f32[1,16], index: 9, kind: input, shape index: {}]   ;;  %s5539_s10 = inlined_call_operand.hbm [shape: f32[2,16,16,16], index: 10, kind: output, shape index: {}]  }
   0x1   :  { %17 = vsyncpa [#allocation3 + $0x1], 0 }
   0x2   :  { %18 = vsyncpa [#allocation4], 0 }
   0x3   :  { %20 = vsyncpa [#allocation4 + $0x1], 0  ;;  %s3663_s13 = smov 0   ;;  %s3665_s14 = smov 0  }
   0x4   :  { %s3667_s15 = smov 0   ;;  %s3669_s16 = smov 0  }
   0x5 LB: > { %5558 = sst [smem:[#allocation8_spill]] %s3590_s15  ;;  %s3684_s17 = sadd.s32 4294967295, %s3594_s16   ;;  %s3594_s16 = sphi %s3669_s16, %s5597_s16   ;;  %s3590_s15 = sphi %s3667_s15, %s5599_s15   ;;  %s3586_s14 = sphi %s3665_s14, %s5601_s14   ;;  %s3582_s13 = sphi %s3663_s13, %s5600_s13  }
   0x6   : > { %s2699_s18 = sadd.s32 4294967294, %s3594_s16   ;;  %s3688_s19 = sadd.s32 1, %s3594_s16  }
   0x7   : > { %5559 = sst [smem:[#allocation9_spill]] %s3688_s19  ;;  %s33_s20 = sadd.s32 1, %s3590_s15 }
   0x8   : > { %s30_s21 = ssub.s32 %s3594_s16, %s3688_s19  ;;  %p40_p0 = scmp.ne.s32.totalorder %s3590_s15, %s3586_s14 }
   0x9   : > { %p31_p1 = scmp.eq.s32.totalorder %s30_s21, 0  ;;  %p41_p2 = scmp.eq.s32.totalorder %s3594_s16, 0 }
   0xa   : > { %p46_p3 = scmp.ne.s32.totalorder %s3586_s14, %s3582_s13  ;;  %p47_p4 = scmp.eq.s32.totalorder %s3684_s17, 0 }
   0xb   : > { %s3700_s22 = scalar_select %p31_p1, %s3590_s15, %s33_s20  }
   0xc   : > { %p3702_p5 = por %p41_p2, %p40_p0  ;;  %p3706_p6 = por %p47_p4, %p46_p3 }
   0xd   : > { %5560 = sst [smem:[#allocation10_spill]] %s3700_s22  ;;  %p259_p7 = scmp.eq.s32.totalorder %s3684_s17, 1 }
   0xe   : > { %p265_p8 = scmp.eq.s32.totalorder %s2699_s18, 1  ;;  %p2795_p10 = scmp.lt.s32.totalorder %s3594_s16, 2 }
   0xf   : > { %p3713_p11 = por %p259_p7, %p40_p0  ;;  %s312_s27 = sand.u32 1, %s3590_s15  }
  0x10   : > { %p3717_p12 = por %p265_p8, %p46_p3  ;;  %s2773_s28 = sshll.u32 %s3594_s16, 8 }
  0x11   : > { %s2702_s29 = sshll.u32 %s312_s27, 8  ;;  %s321_s12 = scalar_lea.hbm %s5529_s0, %s2773_s28 }
  0x12   : > { %s5564_s26 = scalar_select %p3717_p12, 1, 0 }
  0x13   : > { %s322_s20 = sshll.u32 %s321_s12, 4  ;;  %s316_s18 = scalar_lea.vmem [#allocation2], %s2702_s29  ;;  %s323_s20 = int_to_ptr.hbm [resolvable:$true] %s322_s20 }
  0x14   : > { %5565 = sst [smem:[#allocation11_spill]] %s5564_s26  ;;  %s324_s21 = sshll.u32 %s316_s18, 4  ;;  %s325_s21 = int_to_ptr.vmem [resolvable:$true] %s324_s21 }
  0x15   : > { %p3728_p13 = pnand %p2795_p10, %p3702_p5  ;;  %p2705_p0 = scmp.ge.s32.totalorder %s3594_s16, 1 }
  0x16   : > { %p332_p1 = scmp.lt.s32.totalorder %s3594_s16, 3  ;;  %s313_s15 = scalar_lea.sflag [#allocation3], %s312_s27 }
  0x17   : > { %s3498_s19 = sshra.s32 %s323_s20, 4  ;;  %p3502_p3 = pneg %p3728_p13  ;;  %s3499_s19 = int_to_ptr.hbm [resolvable:$true] %s3498_s19 }
  0x18   : > { %s3500_s26 = scalar_lea.hbm %s3499_s19, 256  ;;  %s3505_s23 = scalar_lea.hbm %s5529_s0, 512 }
  0x19   : > { %p3501_p2 = scmp.ne.s32.totalorder %s3499_s19, %s3500_s26  ;;  %p3506_p5 = scmp.lt.s32.totalorder %s3499_s19, %s5529_s0 }
  0x1a   : > { %p3507_p8 = scmp.lt.s32.totalorder %s3505_s23, %s3500_s26 }
  0x1b   : > { %p3503_p4 = pnand %p3502_p3, %p3501_p2 }
  0x1c   : > { %p3508_p10 = por %p3507_p8, %p3506_p5 }
  0x1d   : > { %p3504_p7 = pneg %p3503_p4 }
  0x1f   : > { %p3509_p9 = pnand %p3508_p10, %p3504_p7 }
  0x21   : > { %3512 = shalt.err (!%p3509_p9)
}
  0x22   : > { %s3596_s27 = smov 128   ;;  %s3597_s12 = smov 8  }
  0x23   : > { %2790 = dma.hbm_to_vmem [thread:$0]  (!%p3728_p13), %s323_s20, 4096, %s325_s21, %s313_s15, %s3596_s27, %s3596_s27, %s3597_s12  }
  0x24   : > { %p333_p2 = pnand %p2705_p0, %p332_p1 }
  0x26   : > { %336 = sbr.rel (%p333_p2) target bundleno = 950 (0x3b6), region = 60 }
  0x2b   : > { %s3749_s18 = sand.u32 1, %s3586_s14  }
  0x2c   : > { %s2706_s19 = sshll.u32 %s3749_s18, 8  ;;  %s339_s26 = scalar_lea.sflag [#allocation3], %s3749_s18 }
  0x2d   : > { %s3755_s28 = scalar_lea.vmem [#allocation2], %s2706_s19 }
  0x2e   : > { %3573 = dma.done.wait (%p3706_p6), %s339_s26, 4096  }
  0x2f   : > { %3575 = vsyncadd (%p3706_p6), %s339_s26, 4294963200  ;;  %v2774_v0 = vld [vmem:[%s5530_s1] sm:$0xff]  ;;  %v382_v2 = vld [vmem:[%s3755_s28 + $0x8] sm:$0xff]  ;;  %vm437_vm0 = vcmask 130048   ;;  %v679_v39 = vlaneseq  ;;  %v5544_v43 = vmov 0.0   ;;  %s3599_s23 = smov 4  }
  0x30   : > { %v381_v1 = vld [vmem:[%s3755_s28] sm:$0xff]  ;;  %v407_v4 = vld [vmem:[%s3755_s28 + $0xd0] sm:$0xff]  ;;  %v408_v5 = vld [vmem:[%s3755_s28 + $0xd8] sm:$0xff]  ;;  %493 = vmatpush.bf16.msra.mxu0 %v2774_v0  ;;  %2778 = vmatpush.bf16.msra.mxu3 %v2774_v0  ;;  %s3600_s30 = smov 16   ;;  %s3601_s11 = smov 8   ;;  %vm2088_vm5 = vcmask 1041408  }
  0x31   : > { %v413_v3 = vpack.c.bf16 %v382_v2, %v381_v1  ;;  %v426_v6 = vpack.c.bf16 %v408_v5, %v407_v4  ;;  %v383_v7 = vld [vmem:[%s3755_s28 + $0x10] sm:$0xff]  ;;  %v384_v8 = vld [vmem:[%s3755_s28 + $0x18] sm:$0xff]  ;;  %v409_v9 = vld [vmem:[%s3755_s28 + $0xe0] sm:$0xff]  ;;  %v3811_v46 = vshrl.u32 %v679_v39, 7  ;;  %s3602_s27 = smov 12   ;;  %s3603_s12 = smov 28  }
  0x32   : > { %v410_v10 = vld [vmem:[%s3755_s28 + $0xe8] sm:$0xff]  ;;  %v414_v11 = vpack.c.bf16 %v384_v8, %v383_v7  ;;  %v385_v13 = vld [vmem:[%s3755_s28 + $0x20] sm:$0xff]  ;;  %v387_v16 = vld [vmem:[%s3755_s28 + $0x30] sm:$0xff]  ;;  %s3604_s26 = smov 20   ;;  %s3605_s15 = smov 24   ;;  %vm1742_vm6 = vcmask 31744  }
  0x33   : > { %2712 = vmatmul.msk.bf16.vlgmr.msra.gmra.mxu0 %vm437_vm0, %v413_v3  ;;  %2725 = vmatmul.msk.bf16.vlgmr.msra.gmra.mxu3 %vm437_vm0, %v426_v6  ;;  %v427_v12 = vpack.c.bf16 %v410_v10, %v409_v9  ;;  %v386_v14 = vld [vmem:[%s3755_s28 + $0x28] sm:$0xff]  ;;  %v388_v17 = vld [vmem:[%s3755_s28 + $0x38] sm:$0xff]  ;;  %v389_v19 = vld [vmem:[%s3755_s28 + $0x40] sm:$0xff]  ;;  %v681_v52 = vadd.s32 8, %v3811_v46  ;;  %v3821_v53 = vadd.s32 4294967295, %v3811_v46  ;;  %vm714_vm1 = vcmp.lt.s32.totalorder %v3811_v46, 1 }
  0x34   : > { %v415_v15 = vpack.c.bf16 %v386_v14, %v385_v13  ;;  %v416_v18 = vpack.c.bf16 %v388_v17, %v387_v16  ;;  %v390_v20 = vld [vmem:[%s3755_s28 + $0x48] sm:$0xff]  ;;  %v391_v22 = vld [vmem:[%s3755_s28 + $0x50] sm:$0xff]  ;;  %v392_v23 = vld [vmem:[%s3755_s28 + $0x58] sm:$0xff]  ;;  %vm819_vm2 = vcmp.lt.s32.totalorder %v3811_v46, 7  ;;  %s3606_s22 = smov 32   ;;  %vm1774_vm7 = vcmask 64512  }
  0x35   : > { %v417_v21 = vpack.c.bf16 %v390_v20, %v389_v19  ;;  %v418_v24 = vpack.c.bf16 %v392_v23, %v391_v22  ;;  %v393_v25 = vld [vmem:[%s3755_s28 + $0x60] sm:$0xff]  ;;  %v394_v26 = vld [vmem:[%s3755_s28 + $0x68] sm:$0xff]  ;;  %v395_v28 = vld [vmem:[%s3755_s28 + $0x70] sm:$0xff]  ;;  %v3833_v63 = vadd.s32 1, %v681_v52  ;;  %vm749_vm3 = vcmp.ge.s32.totalorder %v3821_v53, 0  ;;  %s2777_s24 = sshll.u32 %s3684_s17, 8 }
  0x36   : > { %v419_v27 = vpack.c.bf16 %v394_v26, %v393_v25  ;;  %v396_v29 = vld [vmem:[%s3755_s28 + $0x78] sm:$0xff]  ;;  %v397_v31 = vld [vmem:[%s3755_s28 + $0x80] sm:$0xff]  ;;  %v398_v32 = vld [vmem:[%s3755_s28 + $0x88] sm:$0xff]  ;;  %vm1806_vm8 = vcmask 97280   ;;  %vm1871_vm9 = vcmask 162816   ;;  %vm1904_vm10 = vcmask 195584  }
  0x37   : > { %v420_v30 = vpack.c.bf16 %v396_v29, %v395_v28  ;;  %v3799_v33 = vld [vmem:[%s5531_s2] ss:$0 sm:$0xff]  ;;  %v421_v35 = vpack.c.bf16 %v398_v32, %v397_v31  ;;  %v399_v50 = vld [vmem:[%s3755_s28 + $0x90] sm:$0xff]  ;;  %v400_v51 = vld [vmem:[%s3755_s28 + $0x98] sm:$0xff]  ;;  %vm857_vm4 = vcmp.lt.s32.totalorder %v3833_v63, 16  ;;  %vm1937_vm11 = vcmask 228352  }
  0x38   : > { %v3804_v34 = vld [vmem:[%s5532_s3] ss:$0 sm:$0xff]  ;;  %v422_v57 = vpack.c.bf16 %v400_v51, %v399_v50  ;;  %v402_v26 = vld [vmem:[%s3755_s28 + $0xa8] sm:$0xff]  ;;  %vm1970_vm12 = vcmask 261120   ;;  %vm2039_vm13 = vcmask 293888  }
  0x39   : > { %v401_v25 = vld [vmem:[%s3755_s28 + $0xa0] sm:$0xff] }
  0x3a   : > { %v423_v32 = vpack.c.bf16 %v402_v26, %v401_v25  ;;  %v406_v25 = vld [vmem:[%s3755_s28 + $0xc8] sm:$0xff] }
  0x43   : > { %2713 = vmatmul.msk.bf16.gmra.mxu0 %vm437_vm0, %v414_v11  ;;  %2726 = vmatmul.msk.bf16.gmra.mxu3 %vm437_vm0, %v427_v12 }
  0x53   : > { %2714 = vmatmul.msk.bf16.gmra.mxu0 %vm437_vm0, %v415_v15 }
  0x63   : > { %2715 = vmatmul.msk.bf16.gmra.mxu0 %vm437_vm0, %v416_v18 }
  0x73   : > { %2716 = vmatmul.msk.bf16.gmra.mxu0 %vm437_vm0, %v417_v21 }
  0x83   : > { %2717 = vmatmul.msk.bf16.gmra.mxu0 %vm437_vm0, %v418_v24 }
  0x93   : > { %2718 = vmatmul.msk.bf16.gmra.mxu0 %vm437_vm0, %v419_v27 }
  0xa3   : > { %2719 = vmatmul.msk.bf16.gmra.mxu0 %vm437_vm0, %v420_v30 }
  0xb0   : > { %v495_v36 = vpop.f32.mrf.mxu0 }
  0xb1   : > { %v579_v37 = vmul.f32 %v3799_v33, %v495_v36 }
  0xb3   : > { %v615_v38 = vadd.f32 %v3804_v34, %v579_v37  ;;  %2720 = vmatmul.msk.bf16.gmra.mxu0 %vm437_vm0, %v421_v35 }
  0xb5   : > { %v647_v40 = vmax.f32 %v615_v38, 0.0 }
  0xb6   : > { %v560_v41 = vpop.f32.mrf.mxu3 }
  0xb7   : > { %v605_v42 = vmul.f32 %v3799_v33, %v560_v41  ;;  %v2841_v44 = vpack.i.bf16 %v647_v40, %v5544_v43  ;;  %v787_v58 = vrot.slane %v647_v40, 1  ;;  %v682_v0 = vrot.slane %v647_v40, 7 }
  0xb8   : > { %v497_v45 = vpop.f32.mrf.mxu0 }
  0xb9   : > { %v580_v47 = vmul.f32 %v3799_v33, %v497_v45  ;;  %2842 = vrot.lane.b32.xlu0 %v2841_v44, %s3599_s23  ;;  %v641_v48 = vadd.f32 %v3804_v34, %v605_v42 }
  0xbb   : > { %v616_v49 = vadd.f32 %v3804_v34, %v580_v47  ;;  %v3826_v55 = vmax.f32 %v641_v48, 0.0 }
  0xbd   : > { %v3823_v54 = vmax.f32 %v616_v49, 0.0  ;;  %v695_v9 = vrot.slane %v3826_v55, 7  ;;  %v800_v17 = vrot.slane %v3826_v55, 1 }
  0xbe   : > { %v562_v56 = vpop.f32.mrf.mxu3 }
  0xbf   : > { %v606_v59 = vmul.f32 %v3799_v33, %v562_v56  ;;  %v2846_v60 = vpack.i.bf16 %v3823_v54, %v647_v40  ;;  %v803_v61 = vrot.slane %v3823_v54, 1  ;;  %v698_v62 = vrot.slane %v3823_v54, 7 }
  0xc0   : > { %v500_v2 = vpop.f32.mrf.mxu0 }
  0xc1   : > { %v642_v1 = vadd.f32 %v3804_v34, %v606_v59  ;;  %2847 = vrot.lane.b32.xlu0 %v2846_v60, %s3600_s30  ;;  %v820_v3 = vsel %vm819_vm2, %v787_v58, %v803_v61  ;;  %v3843_v5 = vsel %vm714_vm1, %v682_v0, %v698_v62  ;;  %v731_v6 = vsel %vm714_vm1, %v698_v62, %v682_v0  ;;  %v403_v62 = vld [vmem:[%s3755_s28 + $0xb0] sm:$0xff]  ;;  %v404_v0 = vld [vmem:[%s3755_s28 + $0xb8] sm:$0xff] }
  0xc2   : > { %v2851_v4 = vpack.i.bf16 %v820_v3, %v5544_v43  ;;  %v3852_v8 = vsel %vm749_vm3, %v731_v6, 0.0  ;;  %v836_v10 = vsel %vm819_vm2, %v803_v61, %v787_v58  ;;  %v581_v21 = vmul.f32 %v3799_v33, %v500_v2 }
  0xc3   : > { %v3847_v7 = vmax.f32 %v642_v1, 0.0  ;;  %2721 = vmatmul.msk.bf16.gmra.mxu0 %vm437_vm0, %v422_v57  ;;  %v2856_v11 = vpack.i.bf16 %v3843_v5, %v3852_v8  ;;  %v3867_v15 = vsel %vm857_vm4, %v836_v10, 0.0 }
  0xc4   : > { %2852 = vrot.lane.b32.xlu1 %v2851_v4, %s3601_s11  ;;  %v2861_v22 = vpack.i.bf16 %v3867_v15, %v820_v3  ;;  %v617_v29 = vadd.f32 %v3804_v34, %v581_v21 }
  0xc5   : > { %v2866_v12 = vpack.i.bf16 %v3847_v7, %v3826_v55  ;;  %v711_v13 = vrot.slane %v3847_v7, 7  ;;  %2857 = vrot.lane.b32.xlu2 %v2856_v11, %s3602_s27  ;;  %v816_v18 = vrot.slane %v3847_v7, 1 }
  0xc6   : > { %v565_v14 = vpop.f32.mrf.mxu3  ;;  %v649_v42 = vmax.f32 %v617_v29, 0.0 }
  0xc7   : > { %v744_v16 = vsel %vm714_vm1, %v711_v13, %v695_v9  ;;  %v3876_v19 = vsel %vm714_vm1, %v695_v9, %v711_v13  ;;  %v607_v23 = vmul.f32 %v3799_v33, %v565_v14  ;;  %v849_v28 = vsel %vm819_vm2, %v816_v18, %v800_v17 }
  0xc8   : > { %v3880_v20 = vsel %vm749_vm3, %v744_v16, 0.0  ;;  %v502_v24 = vpop.f32.mrf.mxu0  ;;  %v3899_v37 = vsel %vm819_vm2, %v800_v17, %v816_v18  ;;  %v3903_v38 = vsel %vm857_vm4, %v849_v28, 0.0  ;;  %v2876_v51 = vpack.i.bf16 %v649_v42, %v3823_v54 }
  0xc9   : > { %2867 = vrot.lane.b32.xlu0 %v2866_v12, %s3603_s12  ;;  %5567 = vst [vmem:[#allocation12_spill] sm:$0xff] %v3880_v20  ;;  %v2881_v27 = vpack.i.bf16 %v3876_v19, %v3880_v20  ;;  %v582_v30 = vmul.f32 %v3799_v33, %v502_v24  ;;  %v643_v35 = vadd.f32 %v3804_v34, %v607_v23  ;;  %v788_v58 = vrot.slane %v649_v42, 1  ;;  %v405_v24 = vld [vmem:[%s3755_s28 + $0xc0] sm:$0xff] }
  0xca   : > { %v2886_v41 = vpack.i.bf16 %v3903_v38, %v3899_v37  ;;  %v683_v2 = vrot.slane %v649_v42, 7  ;;  %v424_v9 = vpack.c.bf16 %v404_v0, %v403_v62  ;;  %v425_v26 = vpack.c.bf16 %v406_v25, %v405_v24 }
  0xcb   : > { %v618_v40 = vadd.f32 %v3804_v34, %v582_v30  ;;  %v3910_v44 = vmax.f32 %v643_v35, 0.0 }
  0xcc   : > { %2862 = vrot.lane.b32.xlu1 %v2861_v22, %s3604_s26 }
  0xcd   : > { %2882 = vrot.lane.b32.xlu2 %v2881_v27, %s3605_s15  ;;  %v801_v47 = vrot.slane %v3910_v44, 1  ;;  %v650_v49 = vmax.f32 %v618_v40, 0.0  ;;  %v2901_v54 = vpack.i.bf16 %v3910_v44, %v3847_v7  ;;  %v696_v28 = vrot.slane %v3910_v44, 7 }
  0xce   : > { %v567_v31 = vpop.f32.mrf.mxu3 }
  0xcf   : > { %v608_v36 = vmul.f32 %v3799_v33, %v567_v31  ;;  %v804_v59 = vrot.slane %v650_v49, 1  ;;  %v699_v3 = vrot.slane %v650_v49, 7  ;;  %v2906_v6 = vpack.i.bf16 %v650_v49, %v649_v42 }
  0xd0   : > { %v505_v61 = vpop.f32.mrf.mxu0 }
  0xd1   : > { %v644_v39 = vadd.f32 %v3804_v34, %v608_v36  ;;  %2872 = vrot.lane.b32.xlu0 %v2866_v12, %s3600_s30  ;;  %v837_v1 = vsel %vm819_vm2, %v804_v59, %v788_v58  ;;  %v583_v4 = vmul.f32 %v3799_v33, %v505_v61  ;;  %v821_v7 = vsel %vm819_vm2, %v788_v58, %v804_v59 }
  0xd2   : > { %v3947_v10 = vsel %vm857_vm4, %v837_v1, 0.0  ;;  %v732_v11 = vsel %vm714_vm1, %v699_v3, %v683_v2  ;;  %v3960_v14 = vsel %vm714_vm1, %v683_v2, %v699_v3  ;;  %v2916_v23 = vpack.i.bf16 %v821_v7, %v3867_v15 }
  0xd3   : > { %v3912_v45 = vmax.f32 %v644_v39, 0.0  ;;  %2722 = vmatmul.msk.bf16.gmra.mxu0 %vm437_vm0, %v423_v32  ;;  %v619_v12 = vadd.f32 %v3804_v34, %v583_v4  ;;  %v2931_v13 = vpack.i.bf16 %v3947_v10, %v821_v7  ;;  %v3964_v16 = vsel %vm749_vm3, %v732_v11, 0.0 }
  0xd4   : > { %2887 = vrot.lane.b32.xlu1 %v2886_v41, %s3606_s22  ;;  %v2921_v21 = vpack.i.bf16 %v3960_v14, %v3964_v16 }
  0xd5   : > { %v817_v48 = vrot.slane %v3912_v45, 1  ;;  %2892 = vrot.lane.b32.xlu2 %v2881_v27, %s3602_s27  ;;  %v3921_v50 = vpack.i.bf16 %v3912_v45, %v3910_v44  ;;  %v651_v17 = vmax.f32 %v619_v12, 0.0  ;;  %v712_v29 = vrot.slane %v3912_v45, 7 }
  0xd7   : > { %v850_v52 = vsel %vm819_vm2, %v817_v48, %v801_v47  ;;  %v3931_v57 = vsel %vm819_vm2, %v801_v47, %v817_v48  ;;  %v2946_v22 = vpack.i.bf16 %v651_v17, %v650_v49  ;;  %v745_v15 = vsel %vm714_vm1, %v712_v29, %v696_v28 }
  0xd8   : > { %v889_v56 = vsel %vm857_vm4, %v850_v52, 0.0  ;;  %v507_v18 = vpop.f32.mrf.mxu0  ;;  %v3988_v31 = vsel %vm714_vm1, %v696_v28, %v712_v29  ;;  %v3992_v32 = vsel %vm749_vm3, %v745_v15, 0.0  ;;  %v684_v44 = vrot.slane %v651_v17, 7 }
  0xd9   : > { %2877 = vrot.lane.b32.xlu0 %v2876_v51, %s3599_s23  ;;  %v3934_v60 = vpack.i.bf16 %v889_v56, %v3931_v57  ;;  %v584_v30 = vmul.f32 %v3799_v33, %v507_v18  ;;  %v3999_v39 = vpack.i.bf16 %v3988_v31, %v3992_v32  ;;  %v789_v52 = vrot.slane %v651_v17, 1 }
  0xda   : > { %v2951_v62 = vpack.i.bf16 %v3931_v57, %v3903_v38 }
  0xdb   : > { %v620_v35 = vadd.f32 %v3804_v34, %v584_v30 }
  0xdc   : > { %2897 = vrot.lane.b32.xlu1 %v2886_v41, %s3604_s26 }
  0xdd   : > { %2902 = vrot.lane.b32.xlu2 %v2901_v54, %s3599_s23  ;;  %v652_v40 = vmax.f32 %v620_v35, 0.0 }
  0xdf   : > { %v2971_v49 = vpack.i.bf16 %v652_v40, %v651_v17 }
  0xe0   : > { %v510_v27 = vpop.f32.mrf.mxu0 }
  0xe1   : > { %2907 = vrot.lane.b32.xlu0 %v2906_v6, %s3603_s12  ;;  %v585_v41 = vmul.f32 %v3799_v33, %v510_v27 }
  0xe3   : > { %2723 = vmatmul.msk.bf16.gmra.mxu0 %vm437_vm0, %v424_v9  ;;  %v621_v47 = vadd.f32 %v3804_v34, %v585_v41 }
  0xe4   : > { %2932 = vrot.lane.b32.xlu1 %v2931_v13, %s3606_s22 }
  0xe5   : > { %2912 = vrot.lane.b32.xlu2 %v2906_v6, %s3600_s30  ;;  %v653_v58 = vmax.f32 %v621_v47, 0.0 }
  0xe7   : > { %v685_v2 = vrot.slane %v653_v58, 7  ;;  %v790_v18 = vrot.slane %v653_v58, 1 }
  0xe8   : > { %v512_v36 = vpop.f32.mrf.mxu0 }
  0xe9   : > { %2922 = vrot.lane.b32.xlu0 %v2921_v21, %s3602_s27  ;;  %v586_v42 = vmul.f32 %v3799_v33, %v512_v36 }
  0xeb   : > { %v622_v48 = vadd.f32 %v3804_v34, %v586_v42 }
  0xec   : > { %2947 = vrot.lane.b32.xlu1 %v2946_v22, %s3599_s23 }
  0xed   : > { %2917 = vrot.lane.b32.xlu2 %v2916_v23, %s3601_s11  ;;  %v654_v59 = vmax.f32 %v622_v48, 0.0 }
  0xef   : > { %v701_v3 = vrot.slane %v654_v59, 7  ;;  %v3011_v29 = vpack.i.bf16 %v654_v59, %v653_v58 }
  0xf0   : > { %v515_v61 = vpop.f32.mrf.mxu0 }
  0xf1   : > { %2937 = vrot.lane.b32.xlu0 %v2931_v13, %s3604_s26  ;;  %v734_v9 = vsel %vm714_vm1, %v701_v3, %v685_v2  ;;  %v4039_v11 = vsel %vm714_vm1, %v685_v2, %v701_v3  ;;  %v587_v23 = vmul.f32 %v3799_v33, %v515_v61 }
  0xf2   : > { %v4043_v12 = vsel %vm749_vm3, %v734_v9, 0.0 }
  0xf3   : > { %2724 = vmatmul.msk.bf16.gmra.mxu0 %vm437_vm0, %v425_v26  ;;  %v3021_v17 = vpack.i.bf16 %v4039_v11, %v4043_v12  ;;  %v3001_v26 = vpack.i.bf16 %v653_v58, %v652_v40  ;;  %v623_v28 = vadd.f32 %v3804_v34, %v587_v23 }
  0xf4   : > { %1106 = vrot.lane.b32.xlu1 %v889_v56, %s3601_s11  ;;  %v805_v56 = vrot.slane %v652_v40, 1 }
  0xf5   : > { %2927 = vrot.lane.b32.xlu2 %v2921_v21, %s3605_s15  ;;  %v806_v21 = vrot.slane %v654_v59, 1  ;;  %v655_v30 = vmax.f32 %v623_v28, 0.0 }
  0xf6   : > { %v838_v54 = vsel %vm819_vm2, %v805_v56, %v789_v52  ;;  %v822_v38 = vsel %vm819_vm2, %v789_v52, %v805_v56  ;;  %v2023_v52 = vld [vmem:[%s5533_s4 + $0x10] sm:$0x3] }
  0xf7   : > { %v865_v4 = vsel %vm857_vm4, %v838_v54, 0.0  ;;  %v2976_v7 = vpack.i.bf16 %v822_v38, %v3947_v10  ;;  %v839_v10 = vsel %vm819_vm2, %v806_v21, %v790_v18  ;;  %v823_v24 = vsel %vm819_vm2, %v790_v18, %v806_v21 }
  0xf8   : > { %v2996_v57 = vpack.i.bf16 %v865_v4, %v822_v38  ;;  %v517_v13 = vpop.f32.mrf.mxu0  ;;  %v867_v22 = vsel %vm857_vm4, %v839_v10, 0.0  ;;  %v686_v56 = vrot.slane %v655_v30, 7  ;;  %v412_v38 = vld [vmem:[%s3755_s28 + $0xf8] sm:$0xff] }
  0xf9   : > { %983 = vrot.lane.b32.xlu0 %v3912_v45, %s3599_s23  ;;  %v700_v45 = vrot.slane %v652_v40, 7  ;;  %v3031_v27 = vpack.i.bf16 %v867_v22, %v823_v24  ;;  %v588_v15 = vmul.f32 %v3799_v33, %v517_v13  ;;  %v3041_v40 = vpack.i.bf16 %v655_v30, %v654_v59 }
  0xfa   : > { %v2033_v59 = vunpack.c.l.b16 %v2023_v52 }
  0xfb   : > { %v733_v51 = vsel %vm714_vm1, %v700_v45, %v684_v44  ;;  %v4019_v0 = vsel %vm714_vm1, %v684_v44, %v700_v45  ;;  %v624_v36 = vadd.f32 %v3804_v34, %v588_v15  ;;  %v3016_v45 = vpack.i.bf16 %v823_v24, %v865_v4 }
  0xfc   : > { %2962 = vrot.lane.b32.xlu1 %v3934_v60, %s3606_s22  ;;  %v4023_v1 = vsel %vm749_vm3, %v733_v51, 0.0  ;;  %v2036_v54 = vpack.c.b16 %v2033_v59, %v2033_v59 }
  0xfd   : > { %2957 = vrot.lane.b32.xlu2 %v3999_v39, %s3605_s15  ;;  %v2981_v6 = vpack.i.bf16 %v4019_v0, %v4023_v1  ;;  %v4068_v42 = vmax.f32 %v624_v36, 0.0 }
  0xfe   : > { %v2090_v4 = vsel %vm2088_vm5, %v2036_v54, 0 }
  0xff   : > { %v3051_v47 = vpack.i.bf16 %v4068_v42, %v655_v30  ;;  %v807_v51 = vrot.slane %v4068_v42, 1  ;;  %v702_v58 = vrot.slane %v4068_v42, 7  ;;  %2097 = vmatpush.bf16.msra.mxu1 %v2090_v4  ;;  %2779 = vmatpush.bf16.msrb.mxu3 %v2090_v4 }
 0x100   : > { %v520_v25 = vpop.f32.mrf.mxu0 }
 0x101   : > { %2942 = vrot.lane.b32.xlu0 %v3921_v50, %s3603_s12  ;;  %v735_v3 = vsel %vm714_vm1, %v702_v58, %v686_v56  ;;  %v589_v9 = vmul.f32 %v3799_v33, %v520_v25  ;;  %v4103_v21 = vsel %vm714_vm1, %v686_v56, %v702_v58 }
 0x102   : > { %v4107_v10 = vsel %vm749_vm3, %v735_v3, 0.0 }
 0x103   : > { %v625_v28 = vadd.f32 %v3804_v34, %v589_v9 }
 0x104   : > { %2972 = vrot.lane.b32.xlu1 %v2971_v49, %s3600_s30 }
 0x105   : > { %2967 = vrot.lane.b32.xlu2 %v2971_v49, %s3603_s12  ;;  %v791_v49 = vrot.slane %v655_v30, 1 }
 0x107   : > { %v824_v2 = vsel %vm819_vm2, %v791_v49, %v807_v51  ;;  %v840_v23 = vsel %vm819_vm2, %v807_v51, %v791_v49  ;;  %v657_v49 = vmax.f32 %v625_v28, 0.0 }
 0x108   : > { %v522_v41 = vpop.f32.mrf.mxu0 }
 0x109   : > { %2952 = vrot.lane.b32.xlu0 %v2951_v62, %s3601_s11  ;;  %v792_v56 = vrot.slane %v657_v49, 1  ;;  %v687_v59 = vrot.slane %v657_v49, 7 }
 0x10c   : > { %2982 = vrot.lane.b32.xlu1 %v2981_v6, %s3602_s27 }
 0x10d   : > { %2997 = vrot.lane.b32.xlu2 %v2996_v57, %s3604_s26 }
 0x110   : > { %v4082_v61 = vpop.f32.mrf.mxu0 }
 0x111   : > { %2977 = vrot.lane.b32.xlu0 %v2976_v7, %s3601_s11  ;;  %v590_v7 = vmul.f32 %v3799_v33, %v522_v41  ;;  %v2775_v41 = vld [vmem:[%s5533_s4] sm:$0xff] }
 0x114   : > { %2987 = vrot.lane.b32.xlu1 %v2981_v6, %s3605_s15  ;;  %v411_v6 = vld [vmem:[%s3755_s28 + $0xf0] sm:$0xff] }
 0x115   : > { %3022 = vrot.lane.b32.xlu2 %v3021_v17, %s3602_s27 }
 0x118   : > { %v527_v30 = vpop.f32.mrf.mxu0 }
 0x119   : > { %2992 = vrot.lane.b32.xlu0 %v2996_v57, %s3606_s22  ;;  %v428_v57 = vpack.c.bf16 %v412_v38, %v411_v6  ;;  %v3081_v6 = vpack.i.bf16 %v657_v49, %v4068_v42 }
 0x11b   : > { %2727 = vmatmul.msk.bf16.gmra.mxu3 %vm437_vm0, %v428_v57 }
 0x11c   : > { %3002 = vrot.lane.b32.xlu1 %v3001_v26, %s3599_s23  ;;  %v3061_v26 = vpack.i.bf16 %v4103_v21, %v4107_v10 }
 0x11d   : > { %3032 = vrot.lane.b32.xlu2 %v3031_v27, %s3606_s22 }
 0x11f   : > { %v4062_v35 = vpop.permute.xlu2 %2857 }
 0x121   : > { %3012 = vrot.lane.b32.xlu0 %v3011_v29, %s3600_s30 }
 0x124   : > { %3007 = vrot.lane.b32.xlu1 %v3011_v29, %s3603_s12  ;;  %v626_v29 = vadd.f32 %v3804_v34, %v590_v7  ;;  %v591_v7 = vmul.f32 %v3799_v33, %v4082_v61 }
 0x125   : > { %3042 = vrot.lane.b32.xlu2 %v3041_v40, %s3599_s23 }
 0x126   : > { %v4138_v51 = vmax.f32 %v626_v29, 0.0 }
 0x127   : > { %v4070_v44 = vpop.permute.xlu2 %2882 }
 0x128   : > { %v808_v58 = vrot.slane %v4138_v51, 1  ;;  %v703_v54 = vrot.slane %v4138_v51, 7  ;;  %v3091_v3 = vpack.i.bf16 %v4138_v51, %v657_v49 }
 0x129   : > { %3027 = vrot.lane.b32.xlu0 %v3021_v17, %s3605_s15  ;;  %v3056_v17 = vpack.i.bf16 %v824_v2, %v867_v22  ;;  %v2776_v22 = vld [vmem:[%s5533_s4 + $0x8] sm:$0xff] }
 0x12a   : > { %2098 = vmatpush.bf16.msra.mxu1 %v2776_v22  ;;  %2780 = vmatpush.bf16.msrb.mxu3 %v2776_v22  ;;  %v825_v38 = vsel %vm819_vm2, %v792_v56, %v808_v58  ;;  %v736_v57 = vsel %vm714_vm1, %v703_v54, %v687_v59 }
 0x12b   : > { %v4074_v48 = vpop.permute.xlu0 %2842  ;;  %v4171_v42 = vsel %vm749_vm3, %v736_v57, 0.0  ;;  %v2859_v57 = vunpack.i.l.bf16 %v4062_v35 }
 0x12c   : > { %3017 = vrot.lane.b32.xlu1 %v3016_v45, %s3601_s11  ;;  %v2845_v18 = vunpack.i.h.bf16 %v4074_v48  ;;  %v2844_v61 = vunpack.i.l.bf16 %v4074_v48 }
 0x12d   : > { %3052 = vrot.lane.b32.xlu2 %v3051_v47, %s3600_s30 }
 0x12e   : > { %v1744_v15 = vsel %vm1742_vm6, %v3852_v8, %v2845_v18  ;;  %2099 = vmatpush.bf16.msra.mxu1 %v2775_v41  ;;  %2781 = vmatpush.bf16.msrb.mxu3 %v2775_v41  ;;  %v4167_v18 = vsel %vm714_vm1, %v687_v59, %v703_v54  ;;  %v1743_v48 = vsel %vm1742_vm6, 0.0, %v2844_v61 }
 0x12f   : > { %v4085_v62 = vpop.permute.xlu2 %2892 }
 0x130   : > { %5568 = vst [vmem:[#allocation13_spill] sm:$0xff] %v4085_v62 }
 0x131   : > { %3047 = vrot.lane.b32.xlu0 %v3051_v47, %s3603_s12 }
 0x133   : > { %v4097_v13 = vpop.permute.xlu0 %2847 }
 0x134   : > { %3037 = vrot.lane.b32.xlu1 %v3031_v27, %s3604_s26  ;;  %v869_v27 = vsel %vm857_vm4, %v840_v23, 0.0  ;;  %v592_v23 = vmul.f32 %v3799_v33, %v527_v30  ;;  %v2849_v61 = vunpack.i.l.bf16 %v4097_v13 }
 0x135   : > { %3057 = vrot.lane.b32.xlu2 %v3056_v17, %s3601_s11  ;;  %v3071_v45 = vpack.i.bf16 %v869_v27, %v824_v2  ;;  %v4149_v2 = vpop.f32.mrf.mxu0  ;;  %v3096_v17 = vpack.i.bf16 %v825_v38, %v869_v27  ;;  %v627_v27 = vadd.f32 %v3804_v34, %v591_v7 }
 0x136   : > { %v4116_v24 = vpop.permute.xlu1 %2852  ;;  %v628_v30 = vadd.f32 %v3804_v34, %v592_v23 }
 0x137   : > { %v2855_v25 = vunpack.i.h.bf16 %v4116_v24  ;;  %v4127_v36 = vpop.permute.xlu2 %2902  ;;  %v2854_v28 = vunpack.i.l.bf16 %v4116_v24  ;;  %v4202_v54 = vmax.f32 %v627_v27, 0.0 }
 0x139   : > { %v4133_v40 = vsel %vm1774_vm7, %v1744_v15, %v2855_v25  ;;  %3062 = vrot.lane.b32.xlu0 %v3061_v26, %s3602_s27  ;;  %v841_v25 = vsel %vm819_vm2, %v808_v58, %v792_v56  ;;  %v1775_v58 = vsel %vm1774_vm7, %v1743_v48, %v2854_v28  ;;  %v3121_v43 = vpack.i.bf16 %v4202_v54, %v4138_v51 }
 0x13a   : > { %v593_v51 = vmul.f32 %v3799_v33, %v4149_v2 }
 0x13b   : > { %v4136_v47 = vpop.permute.xlu0 %2867 }
 0x13c   : > { %5569 = vst [vmem:[#allocation14_spill] sm:$0xff] %v4136_v47  ;;  %3072 = vrot.lane.b32.xlu1 %v3071_v45, %s3606_s22 }
 0x13d   : > { %3067 = vrot.lane.b32.xlu2 %v3061_v26, %s3605_s15  ;;  %v3101_v26 = vpack.i.bf16 %v4167_v18, %v4171_v42  ;;  %v532_v15 = vpop.f32.mrf.mxu0 }
 0x13e   : > { %v4142_v8 = vpop.permute.xlu1 %2862 }
 0x13f   : > { %v4144_v52 = vpop.permute.xlu2 %2912  ;;  %v2864_v23 = vunpack.i.l.bf16 %v4142_v8  ;;  %v2865_v28 = vunpack.i.h.bf16 %v4142_v8 }
 0x141   : > { %3077 = vrot.lane.b32.xlu0 %v3071_v45, %s3604_s26  ;;  %v4191_v45 = vsel %vm857_vm4, %v841_v25, 0.0 }
 0x142   : > { %v3111_v59 = vpack.i.bf16 %v4191_v45, %v825_v38  ;;  %v688_v38 = vrot.slane %v4202_v54, 7 }
 0x143   : > { %v4152_v4 = vpop.permute.xlu0 %2872 }
 0x144   : > { %5570 = vst [vmem:[#allocation15_spill] sm:$0xff] %v4152_v4  ;;  %3092 = vrot.lane.b32.xlu1 %v3091_v3, %s3600_s30 }
 0x145   : > { %3082 = vrot.lane.b32.xlu2 %v3081_v6, %s3599_s23  ;;  %v4204_v6 = vmax.f32 %v628_v30, 0.0  ;;  %v4224_v20 = vpop.f32.mrf.mxu0 }
 0x146   : > { %v4161_v9 = vpop.permute.xlu1 %2887 }
 0x147   : > { %5571 = vst [vmem:[#allocation16_spill] sm:$0xff] %v4161_v9  ;;  %v4174_v22 = vpop.permute.xlu2 %2917  ;;  %v704_v25 = vrot.slane %v4204_v6, 7 }
 0x148   : > { %v2920_v49 = vunpack.i.h.bf16 %v4174_v22 }
 0x149   : > { %3097 = vrot.lane.b32.xlu0 %v3096_v17, %s3601_s11 }
 0x14b   : > { %v4184_v29 = vpop.permute.xlu0 %2877 }
 0x14c   : > { %v2880_v41 = vunpack.i.h.bf16 %v4184_v29  ;;  %3102 = vrot.lane.b32.xlu1 %v3101_v26, %s3602_s27 }
 0x14d   : > { %3087 = vrot.lane.b32.xlu2 %v3091_v3, %s3603_s12  ;;  %v1807_v3 = vsel %vm1806_vm8, %v1775_v58, %v2859_v57 }
 0x14e   : > { %v1746_v24 = vsel %vm1742_vm6, %v3964_v16, %v2880_v41  ;;  %v4198_v56 = vpop.permute.xlu1 %2897  ;;  %v2860_v16 = vunpack.i.h.bf16 %v4062_v35  ;;  %v2850_v35 = vunpack.i.h.bf16 %v4097_v13 }
 0x14f   : > { %5572 = vst [vmem:[#allocation17_spill] sm:$0xff] %v4198_v56  ;;  %v2928_v7 = vpop.permute.xlu2 %2927  ;;  %v4208_v17 = vsel %vm1774_vm7, %v1746_v24, %v2920_v49  ;;  %v1839_v24 = vsel %vm437_vm0, %v1807_v3, %v2849_v61 }
 0x150   : > { %v1808_v27 = vsel %vm1806_vm8, %v1775_v58, %v2860_v16  ;;  %v2929_v30 = vunpack.i.l.bf16 %v2928_v7  ;;  %v2930_v48 = vunpack.i.h.bf16 %v2928_v7  ;;  %v1872_v58 = vsel %vm1871_vm9, %v1839_v24, %v2864_v23 }
 0x151   : > { %3112 = vrot.lane.b32.xlu0 %v3111_v59, %s3606_s22  ;;  %v1840_v8 = vsel %vm437_vm0, %v1808_v27, %v2850_v35  ;;  %v594_v27 = vmul.f32 %v3799_v33, %v532_v15 }
 0x152   : > { %v1873_v7 = vsel %vm1871_vm9, %v1840_v8, %v2865_v28  ;;  %v1905_v16 = vsel %vm1904_vm10, %v1872_v58, %v2929_v30  ;;  %v4245_v30 = vsel %vm714_vm1, %v688_v38, %v704_v25  ;;  %v629_v8 = vadd.f32 %v3804_v34, %v593_v51 }
 0x153   : > { %v2908_v41 = vpop.permute.xlu0 %2907  ;;  %v1906_v23 = vsel %vm1904_vm10, %v1873_v7, %v2930_v48  ;;  %v3126_v48 = vpack.i.bf16 %v4204_v6, %v4202_v54  ;;  %v630_v58 = vadd.f32 %v3804_v34, %v594_v27 }
 0x154   : > { %v2909_v49 = vunpack.i.l.bf16 %v2908_v41  ;;  %3107 = vrot.lane.b32.xlu1 %v3101_v26, %s3605_s15  ;;  %v2910_v57 = vunpack.i.h.bf16 %v2908_v41  ;;  %v737_v26 = vsel %vm714_vm1, %v704_v25, %v688_v38  ;;  %v661_v27 = vmax.f32 %v629_v8, 0.0 }
 0x155   : > { %3117 = vrot.lane.b32.xlu2 %v3111_v59, %s3604_s26  ;;  %v4249_v2 = vsel %vm749_vm3, %v737_v26, 0.0 }
 0x156   : > { %v2933_v13 = vpop.permute.xlu1 %2932  ;;  %v1938_v59 = vsel %vm1937_vm11, %v1905_v16, %v2909_v49  ;;  %v1939_v35 = vsel %vm1937_vm11, %v1906_v23, %v2910_v57  ;;  %v809_v57 = vrot.slane %v4204_v6, 1  ;;  %v3141_v25 = vpack.i.bf16 %v4245_v30, %v4249_v2 }
 0x157   : > { %v2935_v3 = vunpack.i.h.bf16 %v2933_v13  ;;  %v2934_v61 = vunpack.i.l.bf16 %v2933_v13  ;;  %v4238_v41 = vpop.permute.xlu2 %2957  ;;  %v2914_v13 = vunpack.i.l.bf16 %v4144_v52  ;;  %v4280_v23 = vmax.f32 %v630_v58, 0.0 }
 0x158   : > { %5573 = vst [vmem:[#allocation18_spill] sm:$0xff] %v4238_v41 }
 0x159   : > { %3122 = vrot.lane.b32.xlu0 %v3121_v43, %s3599_s23  ;;  %v1971_v28 = vsel %vm1970_vm12, %v1938_v59, %v2934_v61  ;;  %v1972_v15 = vsel %vm1970_vm12, %v1939_v35, %v2935_v3  ;;  %v793_v43 = vrot.slane %v4202_v54, 1  ;;  %v537_v61 = vpop.f32.mrf.mxu0  ;;  %v705_v8 = vrot.slane %v4280_v23, 7 }
 0x15a   : > { %v2003_v24 = vpack.c.bf16 %v1972_v15, %v1971_v28  ;;  %v794_v15 = vrot.slane %v661_v27, 1 }
 0x15b   : > { %v4254_v49 = vpop.permute.xlu0 %2922  ;;  %v842_v7 = vsel %vm819_vm2, %v809_v57, %v793_v43  ;;  %v826_v3 = vsel %vm819_vm2, %v793_v43, %v809_v57 }
 0x15c   : > { %v2924_v38 = vunpack.i.l.bf16 %v4254_v49  ;;  %3127 = vrot.lane.b32.xlu1 %v3126_v48, %s3603_s12  ;;  %2736 = vmatmul.msk.bf16.vlgmr.msra.gmra.mxu1 %vm2039_vm13, %v2003_v24  ;;  %v3136_v59 = vpack.i.bf16 %v826_v3, %v4191_v45  ;;  %v810_v24 = vrot.slane %v4280_v23, 1  ;;  %v689_v45 = vrot.slane %v661_v27, 7 }
 0x15d   : > { %3142 = vrot.lane.b32.xlu2 %v3141_v25, %s3602_s27 }
 0x15e   : > { %v1809_v54 = vsel %vm1806_vm8, %v4133_v40, %v2924_v38  ;;  %v4269_v26 = vpop.permute.xlu1 %2947  ;;  %v873_v40 = vsel %vm857_vm4, %v842_v7, 0.0 }
 0x15f   : > { %v4274_v16 = vsel %vm437_vm0, %v1809_v54, %v2914_v13  ;;  %v4278_v51 = vpop.permute.xlu2 %2967  ;;  %v3151_v28 = vpack.i.bf16 %v873_v40, %v826_v3 }
 0x161   : > { %3132 = vrot.lane.b32.xlu0 %v3126_v48, %s3600_s30  ;;  %v827_v48 = vsel %vm819_vm2, %v794_v15, %v810_v24  ;;  %v4296_v38 = vpop.f32.mrf.mxu0 }
 0x162   : > { %v3176_v54 = vpack.i.bf16 %v827_v48, %v873_v40 }
 0x163   : > { %v4286_v35 = vpop.permute.xlu0 %2937 }
 0x164   : > { %3137 = vrot.lane.b32.xlu1 %v3136_v59, %s3601_s11  ;;  %v738_v59 = vsel %vm714_vm1, %v705_v8, %v689_v45 }
 0x165   : > { %3152 = vrot.lane.b32.xlu2 %v3151_v28, %s3606_s22  ;;  %v4320_v40 = vsel %vm749_vm3, %v738_v59, 0.0 }
 0x166   : > { %v1107_v43 = vpop.permute.xlu1 %1106 }
 0x167   : > { %v4291_v57 = vpop.permute.xlu2 %2997 }
 0x169   : > { %3147 = vrot.lane.b32.xlu0 %v3141_v25, %s3605_s15  ;;  %v3166_v25 = vpack.i.bf16 %v4280_v23, %v661_v27 }
 0x16b   : > { %v984_v58 = vpop.permute.xlu0 %983 }
 0x16c   : > { %v1773_v13 = vsel %vm1742_vm6, %v3988_v31, %v984_v58  ;;  %3157 = vrot.lane.b32.xlu1 %v3151_v28, %s3604_s26  ;;  %v4316_v31 = vsel %vm714_vm1, %v689_v45, %v705_v8  ;;  %v3161_v28 = vpack.i.bf16 %v661_v27, %v4204_v6  ;;  %v596_v58 = vmul.f32 %v3799_v33, %v537_v61 }
 0x16d   : > { %v4303_v7 = vsel %vm1774_vm7, %v1773_v13, %v1107_v43  ;;  %3177 = vrot.lane.b32.xlu2 %v3176_v54, %s3601_s11  ;;  %v595_v43 = vmul.f32 %v3799_v33, %v4224_v20  ;;  %v542_v54 = vpop.f32.mrf.mxu0  ;;  %v3181_v45 = vpack.i.bf16 %v4316_v31, %v4320_v40  ;;  %v843_v8 = vsel %vm819_vm2, %v810_v24, %v794_v15 }
 0x16e   : > { %5574 = vst [vmem:[#allocation19_spill] sm:$0xff] %v4303_v7  ;;  %v4307_v3 = vpop.permute.xlu1 %2962  ;;  %v632_v20 = vadd.f32 %v3804_v34, %v596_v58  ;;  %v4340_v61 = vsel %vm857_vm4, %v843_v8, 0.0  ;;  %v2904_v7 = vunpack.i.l.bf16 %v4127_v36 }
 0x16f   : > { %5575 = vst [vmem:[#allocation20_spill] sm:$0xff] %v4307_v3  ;;  %v4311_v41 = vpop.permute.xlu2 %3022  ;;  %v631_v6 = vadd.f32 %v3804_v34, %v595_v43  ;;  %v3186_v15 = vpack.i.bf16 %v4340_v61, %v827_v48 }
 0x170   : > { %v1771_v8 = vsel %vm1742_vm6, %v3876_v19, %v2904_v7  ;;  %v2919_v19 = vunpack.i.l.bf16 %v4174_v22  ;;  %v2925_v7 = vunpack.i.h.bf16 %v4254_v49 }
 0x171   : > { %3167 = vrot.lane.b32.xlu0 %v3166_v25, %s3603_s12  ;;  %v663_v24 = vmax.f32 %v631_v6, 0.0 }
 0x173   : > { %v4326_v13 = vpop.permute.xlu0 %2942  ;;  %v3201_v22 = vpack.i.bf16 %v663_v24, %v4280_v23 }
 0x174   : > { %5576 = vst [vmem:[#allocation21_spill] sm:$0xff] %v4326_v13  ;;  %3162 = vrot.lane.b32.xlu1 %v3161_v28, %s3599_s23  ;;  %v2905_v28 = vunpack.i.h.bf16 %v4127_v36  ;;  %v4348_v13 = vmax.f32 %v632_v20, 0.0  ;;  %v2879_v36 = vunpack.i.l.bf16 %v4184_v29 }
 0x175   : > { %3182 = vrot.lane.b32.xlu2 %v3181_v45, %s3605_s15  ;;  %v4357_v56 = vpop.f32.mrf.mxu0 }
 0x176   : > { %v4334_v59 = vpop.permute.xlu1 %2972  ;;  %v1772_v58 = vsel %vm1742_vm6, %v3992_v32, %v2905_v28  ;;  %v1745_v29 = vsel %vm1742_vm6, %v3843_v5, %v2879_v36  ;;  %v811_v28 = vrot.slane %v4348_v13, 1  ;;  %v2939_v36 = vunpack.i.l.bf16 %v4286_v35 }
 0x177   : > { %v4342_v27 = vpop.permute.xlu2 %3032 }
 0x179   : > { %3172 = vrot.lane.b32.xlu0 %v3166_v25, %s3600_s30  ;;  %v3206_v25 = vpack.i.bf16 %v4348_v13, %v663_v24 }
 0x17b   : > { %v2953_v43 = vpop.permute.xlu0 %2952 }
 0x17c   : > { %v2955_v3 = vunpack.i.h.bf16 %v2953_v43  ;;  %v2954_v34 = vunpack.i.l.bf16 %v2953_v43  ;;  %3187 = vrot.lane.b32.xlu1 %v3186_v15, %s3606_s22  ;;  %v690_v43 = vrot.slane %v663_v24, 7 }
 0x17d   : > { %3192 = vrot.lane.b32.xlu2 %v3181_v45, %s3602_s27 }
 0x17e   : > { %v4360_v48 = vsel %vm1774_vm7, %v1772_v58, %v2955_v3  ;;  %v4363_v6 = vsel %vm1774_vm7, %v1771_v8, %v2954_v34  ;;  %v4366_v20 = vpop.permute.xlu1 %2982  ;;  %v795_v3 = vrot.slane %v663_v24, 1  ;;  %v706_v34 = vrot.slane %v4348_v13, 7 }
 0x17f   : > { %5577 = vst [vmem:[#allocation22_spill] sm:$0xff] %v4360_v48  ;;  %v4368_v32 = vpop.permute.xlu2 %3042  ;;  %v1777_v58 = vsel %vm1774_vm7, %v1745_v29, %v2919_v19  ;;  %v2940_v8 = vunpack.i.h.bf16 %v4286_v35  ;;  %v2915_v48 = vunpack.i.h.bf16 %v4144_v52  ;;  %v598_v19 = vmul.f32 %v3799_v33, %v542_v54  ;;  %v547_v35 = vpop.f32.mrf.mxu0 }
 0x180   : > { %5578 = vst [vmem:[#allocation23_spill] sm:$0xff] %v4363_v6  ;;  %v844_v5 = vsel %vm819_vm2, %v811_v28, %v795_v3  ;;  %v1810_v49 = vsel %vm1806_vm8, %v1777_v58, %v2925_v7  ;;  %v597_v6 = vmul.f32 %v3799_v33, %v4296_v38  ;;  %v739_v23 = vsel %vm714_vm1, %v706_v34, %v690_v43 }
 0x181   : > { %3207 = vrot.lane.b32.xlu0 %v3206_v25, %s3603_s12  ;;  %v4396_v7 = vsel %vm857_vm4, %v844_v5, 0.0  ;;  %v1842_v52 = vsel %vm437_vm0, %v1810_v49, %v2915_v48  ;;  %v828_v33 = vsel %vm819_vm2, %v795_v3, %v811_v28  ;;  %v1874_v38 = vsel %vm1871_vm9, %v4274_v16, %v2939_v36  ;;  %v4418_v48 = vld [vmem:[%s5532_s3] ss:$0 sm:$0xff] }
 0x182   : > { %v1875_v54 = vsel %vm1871_vm9, %v1842_v52, %v2940_v8  ;;  %v4413_v5 = vsel %vm749_vm3, %v739_v23, 0.0  ;;  %v633_v3 = vadd.f32 %v4418_v48, %v597_v6  ;;  %v2969_v49 = vunpack.i.l.bf16 %v4278_v51 }
 0x183   : > { %v4377_v45 = vpop.permute.xlu0 %2977  ;;  %v3216_v9 = vpack.i.bf16 %v828_v33, %v4340_v61 }
 0x184   : > { %3197 = vrot.lane.b32.xlu1 %v3186_v15, %s3604_s26 }
 0x185   : > { %3202 = vrot.lane.b32.xlu2 %v3201_v22, %s3599_s23  ;;  %v4409_v22 = vsel %vm714_vm1, %v690_v43, %v706_v34  ;;  %v634_v43 = vadd.f32 %v4418_v48, %v598_v19  ;;  %v2970_v34 = vunpack.i.h.bf16 %v4278_v51 }
 0x186   : > { %v2988_v15 = vpop.permute.xlu1 %2987  ;;  %v3221_v6 = vpack.i.bf16 %v4409_v22, %v4413_v5 }
 0x187   : > { %v2990_v24 = vunpack.i.h.bf16 %v2988_v15  ;;  %v2989_v29 = vunpack.i.l.bf16 %v2988_v15  ;;  %v4399_v58 = vpop.permute.xlu2 %3052 }
 0x189   : > { %3212 = vrot.lane.b32.xlu0 %v3206_v25, %s3600_s30  ;;  %v1908_v16 = vsel %vm1904_vm10, %v1875_v54, %v2990_v24  ;;  %v1907_v28 = vsel %vm1904_vm10, %v1874_v38, %v2989_v29  ;;  %v3226_v25 = vpack.i.bf16 %v4396_v7, %v828_v33  ;;  %v665_v29 = vmax.f32 %v633_v3, 0.0  ;;  %v4446_v3 = vpop.f32.mrf.mxu0 }
 0x18a   : > { %v1940_v23 = vsel %vm1937_vm11, %v1907_v28, %v2969_v49  ;;  %v1941_v24 = vsel %vm1937_vm11, %v1908_v16, %v2970_v34  ;;  %v4437_v38 = vmax.f32 %v634_v43, 0.0  ;;  %v2949_v54 = vunpack.i.l.bf16 %v4269_v26 }
 0x18b   : > { %v2993_v8 = vpop.permute.xlu0 %2992  ;;  %v2979_v28 = vunpack.i.l.bf16 %v4377_v45  ;;  %v691_v16 = vrot.slane %v665_v29, 7  ;;  %v796_v61 = vrot.slane %v665_v29, 1 }
 0x18c   : > { %v2995_v36 = vunpack.i.h.bf16 %v2993_v8  ;;  %v2994_v15 = vunpack.i.l.bf16 %v2993_v8  ;;  %3227 = vrot.lane.b32.xlu1 %v3226_v25, %s3606_s22  ;;  %v707_v34 = vrot.slane %v4437_v38, 7  ;;  %v1747_v43 = vsel %vm1742_vm6, %v3960_v14, %v2949_v54 }
 0x18d   : > { %3222 = vrot.lane.b32.xlu2 %v3221_v6, %s3605_s15  ;;  %v812_v33 = vrot.slane %v4437_v38, 1  ;;  %v2985_v14 = vunpack.i.h.bf16 %v4366_v20 }
 0x18e   : > { %v4433_v19 = vpop.permute.xlu1 %3002  ;;  %v1973_v52 = vsel %vm1970_vm12, %v1940_v23, %v2994_v15  ;;  %v1974_v51 = vsel %vm1970_vm12, %v1941_v24, %v2995_v36  ;;  %v2984_v36 = vunpack.i.l.bf16 %v4366_v20  ;;  %v1779_v23 = vsel %vm1774_vm7, %v1747_v43, %v2979_v28 }
 0x18f   : > { %v2004_v8 = vpack.c.bf16 %v1974_v51, %v1973_v52  ;;  %v4442_v49 = vpop.permute.xlu2 %3057  ;;  %v740_v54 = vsel %vm714_vm1, %v707_v34, %v691_v16  ;;  %v3241_v28 = vpack.i.bf16 %v665_v29, %v4348_v13  ;;  %v2975_v20 = vunpack.i.h.bf16 %v4334_v59 }
 0x190   : > { %v4487_v13 = vsel %vm749_vm3, %v740_v54, 0.0 }
 0x191   : > { %2737 = vmatmul.msk.bf16.gmra.mxu1 %vm2039_vm13, %v2004_v8  ;;  %3217 = vrot.lane.b32.xlu0 %v3216_v9, %s3601_s11  ;;  %v4460_v9 = vld [vmem:[%s5531_s2] ss:$0 sm:$0xff]  ;;  %v1812_v8 = vsel %vm1806_vm8, %v1779_v23, %v2985_v14  ;;  %v4498_v54 = vpop.f32.mrf.mxu0 }
 0x192   : > { %v599_v24 = vmul.f32 %v4460_v9, %v4357_v56  ;;  %v600_v52 = vmul.f32 %v4460_v9, %v547_v35  ;;  %v829_v56 = vsel %vm819_vm2, %v796_v61, %v812_v33  ;;  %v2974_v35 = vunpack.i.l.bf16 %v4334_v59 }
 0x193   : > { %v4452_v15 = vpop.permute.xlu0 %3012  ;;  %v1844_v59 = vsel %vm437_vm0, %v1812_v8, %v2975_v20  ;;  %v3256_v14 = vpack.i.bf16 %v829_v56, %v4396_v7 }
 0x194   : > { %3237 = vrot.lane.b32.xlu1 %v3226_v25, %s3604_s26  ;;  %v1811_v25 = vsel %vm1806_vm8, %v4208_v17, %v2984_v36  ;;  %v4483_v17 = vsel %vm714_vm1, %v691_v16, %v707_v34  ;;  %v636_v36 = vadd.f32 %v4418_v48, %v600_v52  ;;  %v3246_v16 = vpack.i.bf16 %v4437_v38, %v665_v29 }
 0x195   : > { %3232 = vrot.lane.b32.xlu2 %v3221_v6, %s3602_s27  ;;  %v635_v6 = vadd.f32 %v4418_v48, %v599_v24  ;;  %v1843_v23 = vsel %vm437_vm0, %v1811_v25, %v2974_v35  ;;  %v3000_v24 = vunpack.i.h.bf16 %v4291_v57  ;;  %v845_v34 = vsel %vm819_vm2, %v812_v33, %v796_v61 }
 0x196   : > { %v3008_v51 = vpop.permute.xlu1 %3007  ;;  %v3035_v52 = vunpack.i.h.bf16 %v4342_v27  ;;  %v3261_v7 = vpack.i.bf16 %v4483_v17, %v4487_v13  ;;  %v3034_v35 = vunpack.i.l.bf16 %v4342_v27  ;;  %v3004_v61 = vunpack.i.l.bf16 %v4433_v19 }
 0x197   : > { %v4477_v43 = vpop.permute.xlu2 %3067  ;;  %v3010_v8 = vunpack.i.h.bf16 %v3008_v51  ;;  %v3009_v20 = vunpack.i.l.bf16 %v3008_v51  ;;  %v1877_v29 = vsel %vm1871_vm9, %v1844_v59, %v3000_v24  ;;  %v879_v59 = vsel %vm857_vm4, %v845_v34, 0.0 }
 0x198   : > { %v2950_v27 = vunpack.i.h.bf16 %v4269_v26 }
 0x199   : > { %3242 = vrot.lane.b32.xlu0 %v3241_v28, %s3599_s23  ;;  %v2999_v28 = vunpack.i.l.bf16 %v4291_v57 }
 0x19b   : > { %v3028_v4 = vpop.permute.xlu0 %3027  ;;  %v1876_v57 = vsel %vm1871_vm9, %v1843_v23, %v2999_v28 }
 0x19c   : > { %v3030_v47 = vunpack.i.h.bf16 %v3028_v4  ;;  %v3029_v25 = vunpack.i.l.bf16 %v3028_v4  ;;  %3257 = vrot.lane.b32.xlu1 %v3256_v14, %s3601_s11 }
 0x19d   : > { %3262 = vrot.lane.b32.xlu2 %v3261_v7, %s3605_s15 }
 0x19e   : > { %v1910_v33 = vsel %vm1904_vm10, %v1877_v29, %v3030_v47  ;;  %v1909_v62 = vsel %vm1904_vm10, %v1876_v57, %v3029_v25  ;;  %v4511_v4 = vpop.permute.xlu1 %3017  ;;  %v4523_v25 = vmax.f32 %v635_v6, 0.0  ;;  %v4525_v57 = vmax.f32 %v636_v36, 0.0 }
 0x19f   : > { %v3019_v14 = vunpack.i.l.bf16 %v4511_v4  ;;  %v1942_v51 = vsel %vm1937_vm11, %v1909_v62, %v3009_v20  ;;  %v1943_v23 = vsel %vm1937_vm11, %v1910_v33, %v3010_v8  ;;  %v4519_v24 = vpop.permute.xlu2 %3082  ;;  %v2980_v29 = vunpack.i.h.bf16 %v4377_v45 }
 0x1a0   : > { %v1975_v47 = vsel %vm1970_vm12, %v1942_v51, %v3034_v35  ;;  %v1976_v28 = vsel %vm1970_vm12, %v1943_v23, %v3035_v52  ;;  %v1749_v62 = vsel %vm1742_vm6, %v4019_v0, %v3004_v61  ;;  %v3266_v8 = vpack.i.bf16 %v879_v59, %v829_v56  ;;  %v555_v61 = vpop.f32.mrf.mxu0 }
 0x1a1   : > { %3247 = vrot.lane.b32.xlu0 %v3246_v16, %s3603_s12  ;;  %v2005_v34 = vpack.c.bf16 %v1976_v28, %v1975_v47  ;;  %v1781_v26 = vsel %vm1774_vm7, %v1749_v62, %v3019_v14  ;;  %v1748_v35 = vsel %vm1742_vm6, %v4023_v1, %v2950_v27  ;;  %v3025_v6 = vunpack.i.h.bf16 %v4311_v41 }
 0x1a2   : > { %v1780_v45 = vsel %vm1774_vm7, %v1748_v35, %v2980_v29  ;;  %v3014_v36 = vunpack.i.l.bf16 %v4452_v15  ;;  %v797_v0 = vrot.slane %v4523_v25, 1  ;;  %v813_v56 = vrot.slane %v4525_v57, 1 }
 0x1a3   : > { %v3048_v20 = vpop.permute.xlu0 %3047  ;;  %2738 = vmatmul.msk.bf16.gmra.mxu1 %vm2039_vm13, %v2005_v34  ;;  %v3024_v52 = vunpack.i.l.bf16 %v4311_v41  ;;  %v1814_v33 = vsel %vm1806_vm8, %v1781_v26, %v3025_v6  ;;  %v3015_v14 = vunpack.i.h.bf16 %v4452_v15  ;;  %v692_v15 = vrot.slane %v4523_v25, 7 }
 0x1a4   : > { %3267 = vrot.lane.b32.xlu1 %v3266_v8, %s3606_s22  ;;  %v830_v41 = vsel %vm819_vm2, %v797_v0, %v813_v56  ;;  %v708_v34 = vrot.slane %v4525_v57, 7  ;;  %v3070_v26 = vunpack.i.h.bf16 %v4477_v43  ;;  %v3069_v35 = vunpack.i.l.bf16 %v4477_v43 }
 0x1a5   : > { %3272 = vrot.lane.b32.xlu2 %v3261_v7, %s3602_s27  ;;  %v1813_v27 = vsel %vm1806_vm8, %v1780_v45, %v3024_v52  ;;  %v1846_v29 = vsel %vm437_vm0, %v1814_v33, %v3015_v14  ;;  %v602_v45 = vmul.f32 %v4460_v9, %v4498_v54  ;;  %v3049_v14 = vunpack.i.l.bf16 %v3048_v20 }
 0x1a6   : > { %v3038_v1 = vpop.permute.xlu1 %3037  ;;  %v1845_v28 = vsel %vm437_vm0, %v1813_v27, %v3014_v36  ;;  %v3296_v36 = vpack.i.bf16 %v830_v41, %v879_v59  ;;  %v3286_v54 = vpack.i.bf16 %v4525_v57, %v4523_v25 }
 0x1a7   : > { %v3040_v51 = vunpack.i.h.bf16 %v3038_v1  ;;  %v3039_v23 = vunpack.i.l.bf16 %v3038_v1  ;;  %v4546_v47 = vpop.permute.xlu2 %3087  ;;  %v3050_v1 = vunpack.i.h.bf16 %v3048_v20  ;;  %v638_v59 = vadd.f32 %v4418_v48, %v602_v45 }
 0x1a8   : > { %v557_v27 = vpop.f32.mrf.mxu0 }
 0x1a9   : > { %3252 = vrot.lane.b32.xlu0 %v3246_v16, %s3600_s30  ;;  %v1878_v7 = vsel %vm1871_vm9, %v1845_v28, %v3039_v23  ;;  %v1879_v62 = vsel %vm1871_vm9, %v1846_v29, %v3040_v51  ;;  %v601_v16 = vmul.f32 %v4460_v9, %v4446_v3  ;;  %v741_v51 = vsel %vm714_vm1, %v708_v34, %v692_v15 }
 0x1aa   : > { %v1911_v52 = vsel %vm1904_vm10, %v1878_v7, %v3069_v35  ;;  %v1912_v33 = vsel %vm1904_vm10, %v1879_v62, %v3070_v26  ;;  %v4584_v26 = vsel %vm714_vm1, %v692_v15, %v708_v34  ;;  %v4588_v35 = vsel %vm749_vm3, %v741_v51, 0.0 }
 0x1ab   : > { %v4559_v6 = vpop.permute.xlu0 %3062  ;;  %v1944_v20 = vsel %vm1937_vm11, %v1911_v52, %v3049_v14  ;;  %v1945_v29 = vsel %vm1937_vm11, %v1912_v33, %v3050_v1  ;;  %v604_v52 = vmul.f32 %v4460_v9, %v557_v27  ;;  %v4598_v14 = vmax.f32 %v638_v59, 0.0 }
 0x1ac   : > { %3277 = vrot.lane.b32.xlu1 %v3266_v8, %s3604_s26  ;;  %v637_v8 = vadd.f32 %v4418_v48, %v601_v16  ;;  %v603_v16 = vmul.f32 %v4460_v9, %v555_v61  ;;  %v3301_v15 = vpack.i.bf16 %v4584_v26, %v4588_v35  ;;  %v846_v61 = vsel %vm819_vm2, %v813_v56, %v797_v0 }
 0x1ad   : > { %3297 = vrot.lane.b32.xlu2 %v3296_v36, %s3601_s11  ;;  %v3281_v36 = vpack.i.bf16 %v4523_v25, %v4437_v38  ;;  %v640_v34 = vadd.f32 %v4418_v48, %v604_v52  ;;  %v3064_v52 = vunpack.i.l.bf16 %v4559_v6 }
 0x1ae   : > { %v3073_v43 = vpop.permute.xlu1 %3072  ;;  %v4596_v1 = vmax.f32 %v637_v8, 0.0  ;;  %v639_v38 = vadd.f32 %v4418_v48, %v603_v16 }
 0x1af   : > { %v3075_v23 = vunpack.i.h.bf16 %v3073_v43  ;;  %v3074_v3 = vunpack.i.l.bf16 %v3073_v43  ;;  %v4575_v28 = vpop.permute.xlu2 %3117  ;;  %v881_v43 = vsel %vm857_vm4, %v846_v61, 0.0  ;;  %v4620_v8 = vmax.f32 %v640_v34, 0.0 }
 0x1b0   : > { %v4618_v0 = vmax.f32 %v639_v38, 0.0  ;;  %v3306_v56 = vpack.i.bf16 %v881_v43, %v830_v41 }
 0x1b1   : > { %3287 = vrot.lane.b32.xlu0 %v3286_v54, %s3603_s12  ;;  %v1977_v7 = vsel %vm1970_vm12, %v1944_v20, %v3074_v3  ;;  %v1978_v62 = vsel %vm1970_vm12, %v1945_v29, %v3075_v23  ;;  %v5557_v23 = vrot.slane %v4596_v1, 1  ;;  %v5556_v3 = vrot.slane %v4598_v14, 1 }
 0x1b2   : > { %v2006_v45 = vpack.c.bf16 %v1978_v62, %v1977_v7  ;;  %v3044_v20 = vunpack.i.l.bf16 %v4368_v32  ;;  %v5555_v29 = vrot.slane %v4618_v0, 1  ;;  %v3059_v7 = vunpack.i.l.bf16 %v4442_v49 }
 0x1b3   : > { %v4594_v33 = vpop.permute.xlu0 %3077  ;;  %v4631_v27 = vsel %vm819_vm2, %v5557_v23, %v5556_v3  ;;  %v3020_v62 = vunpack.i.h.bf16 %v4511_v4 }
 0x1b4   : > { %2739 = vmatmul.msk.bf16.gmra.mxu1 %vm2039_vm13, %v2006_v45  ;;  %3282 = vrot.lane.b32.xlu1 %v3281_v36, %s3599_s23  ;;  %v3326_v16 = vpack.i.bf16 %v4631_v27, %v881_v43  ;;  %v815_v45 = vrot.slane %v4620_v8, 1  ;;  %v3065_v36 = vunpack.i.h.bf16 %v4559_v6  ;;  %v3321_v43 = vpack.i.bf16 %v4596_v1, %v4525_v57 }
 0x1b5   : > { %3302 = vrot.lane.b32.xlu2 %v3301_v15, %s3605_s15 }
 0x1b6   : > { %v4608_v25 = vpop.permute.xlu1 %3092  ;;  %v848_v6 = vsel %vm819_vm2, %v815_v45, %v5555_v29 }
 0x1b7   : > { %v4613_v51 = vpop.permute.xlu2 %3142 }
 0x1b9   : > { %3292 = vrot.lane.b32.xlu0 %v3286_v54, %s3600_s30  ;;  %v3005_v54 = vunpack.i.h.bf16 %v4433_v19  ;;  %v1751_v19 = vsel %vm1742_vm6, %v4039_v11, %v3044_v20  ;;  %v3080_v20 = vunpack.i.h.bf16 %v4594_v33 }
 0x1ba   : > { %v1783_v4 = vsel %vm1774_vm7, %v1751_v19, %v3059_v7  ;;  %v3054_v7 = vunpack.i.l.bf16 %v4399_v58 }
 0x1bb   : > { %v4622_v59 = vpop.permute.xlu0 %3097 }
 0x1bc   : > { %3307 = vrot.lane.b32.xlu1 %v3306_v56, %s3606_s22 }
 0x1bd   : > { %3312 = vrot.lane.b32.xlu2 %v3301_v15, %s3602_s27  ;;  %v1750_v15 = vsel %vm1742_vm6, %v4043_v12, %v3005_v54  ;;  %v3079_v12 = vunpack.i.l.bf16 %v4594_v33  ;;  %v3055_v54 = vunpack.i.h.bf16 %v4399_v58  ;;  %v570_v58 = vpop.f32.mrf.mxu3 }
 0x1be   : > { %v4636_v41 = vpop.permute.xlu1 %3102  ;;  %v1782_v38 = vsel %vm1774_vm7, %v1750_v15, %v3020_v62  ;;  %v3331_v62 = vpack.i.bf16 %v4618_v0, %v4598_v14 }
 0x1bf   : > { %v4645_v61 = vpop.permute.xlu2 %3152  ;;  %v1815_v11 = vsel %vm1806_vm8, %v1782_v38, %v3064_v52  ;;  %v4674_v52 = vsel %vm857_vm4, %v848_v6, 0.0  ;;  %v3089_v38 = vunpack.i.l.bf16 %v4546_v47 }
 0x1c0   : > { %v1847_v33 = vsel %vm437_vm0, %v1815_v11, %v3054_v7 }
 0x1c1   : > { %3327 = vrot.lane.b32.xlu0 %v3326_v16, %s3601_s11  ;;  %v1816_v16 = vsel %vm1806_vm8, %v1783_v4, %v3065_v36  ;;  %v3336_v36 = vpack.i.bf16 %v3826_v55, %v4620_v8  ;;  %v3090_v4 = vunpack.i.h.bf16 %v4546_v47  ;;  %v694_v47 = vrot.slane %v4618_v0, 7 }
 0x1c3   : > { %v3113_v34 = vpop.permute.xlu0 %3112 }
 0x1c4   : > { %3317 = vrot.lane.b32.xlu1 %v3306_v56, %s3604_s26  ;;  %v1848_v56 = vsel %vm437_vm0, %v1816_v16, %v3055_v54  ;;  %v3115_v3 = vunpack.i.h.bf16 %v3113_v34  ;;  %v3114_v6 = vunpack.i.l.bf16 %v3113_v34 }
 0x1c5   : > { %3322 = vrot.lane.b32.xlu2 %v3321_v43, %s3599_s23  ;;  %v1880_v43 = vsel %vm1871_vm9, %v1847_v33, %v3079_v12  ;;  %v1881_v29 = vsel %vm1871_vm9, %v1848_v56, %v3080_v20  ;;  %v710_v12 = vrot.slane %v4620_v8, 7  ;;  %v2301_v20 = vld [vmem:[%s5536_s7] sm:$0x3]  ;;  %v5579_v33 = vrot.slane %v4596_v1, 1 }
 0x1c6   : > { %v3108_v57 = vpop.permute.xlu1 %3107  ;;  %v5580_v56 = vrot.slane %v4598_v14, 1 }
 0x1c7   : > { %v3110_v19 = vunpack.i.h.bf16 %v3108_v57  ;;  %v3109_v15 = vunpack.i.l.bf16 %v3108_v57  ;;  %v4682_v55 = vpop.permute.xlu2 %3177  ;;  %v2351_v57 = vsel %vm2088_vm5, %v2301_v20, 0  ;;  %v709_v20 = vrot.slane %v4598_v14, 7 }
 0x1c8   : > { %2360 = vmatpush.bf16.msra.mxu2 %v2351_v57  ;;  %2782 = vmatpush.bf16.msra.mxu3 %v2351_v57 }
 0x1c9   : > { %v1914_v23 = vsel %vm1904_vm10, %v1881_v29, %v3110_v19  ;;  %v1913_v11 = vsel %vm1904_vm10, %v1880_v43, %v3109_v15  ;;  %3332 = vrot.lane.b32.xlu0 %v3331_v62, %s3599_s23  ;;  %v847_v19 = vsel %vm819_vm2, %v5580_v56, %v5579_v33  ;;  %v5581_v15 = vrot.slane %v4618_v0, 1 }
 0x1ca   : > { %v1946_v16 = vsel %vm1937_vm11, %v1913_v11, %v3089_v38  ;;  %v1947_v54 = vsel %vm1937_vm11, %v1914_v23, %v3090_v4  ;;  %v3351_v23 = vpack.i.bf16 %v3899_v37, %v4674_v52  ;;  %v4716_v37 = vpack.i.bf16 %v4620_v8, %v4618_v0 }
 0x1cb   : > { %v4694_v7 = vpop.permute.xlu0 %3122  ;;  %v1979_v29 = vsel %vm1970_vm12, %v1946_v16, %v3114_v6  ;;  %v1980_v34 = vsel %vm1970_vm12, %v1947_v54, %v3115_v3  ;;  %v832_v4 = vsel %vm819_vm2, %v5581_v15, %v815_v45  ;;  %v4724_v38 = vsel %vm857_vm4, %v847_v19, 0.0  ;;  %v572_v45 = vpop.f32.mrf.mxu3 }
 0x1cc   : > { %3337 = vrot.lane.b32.xlu1 %v3336_v36, %s3599_s23  ;;  %v2007_v62 = vpack.c.bf16 %v1980_v34, %v1979_v29  ;;  %v743_v36 = vsel %vm714_vm1, %v710_v12, %v694_v47  ;;  %v3045_v43 = vunpack.i.h.bf16 %v4368_v32  ;;  %v3060_v11 = vunpack.i.h.bf16 %v4442_v49  ;;  %s3548_s23 = scalar_lea.hbm %s5539_s10, 512 }
 0x1cd   : > { %3352 = vrot.lane.b32.xlu2 %v3351_v23, %s3601_s11  ;;  %v3084_v16 = vunpack.i.l.bf16 %v4519_v24  ;;  %v4735_v0 = vsel %vm714_vm1, %v694_v47, %v710_v12  ;;  %v4739_v8 = vsel %vm749_vm3, %v743_v36, 0.0  ;;  %v3099_v32 = vunpack.i.l.bf16 %v4622_v59 }
 0x1ce   : > { %2740 = vmatmul.msk.bf16.gmra.mxu1 %vm2039_vm13, %v2007_v62  ;;  %v4710_v3 = vpop.permute.xlu1 %3127  ;;  %v3346_v54 = vpack.i.bf16 %v832_v4, %v4724_v38  ;;  %v693_v49 = vrot.slane %v4596_v1, 7  ;;  %v3105_v29 = vunpack.i.h.bf16 %v4636_v41  ;;  %v3104_v34 = vunpack.i.l.bf16 %v4636_v41 }
 0x1cf   : > { %v4727_v6 = vpop.permute.xlu2 %3182  ;;  %v609_v47 = vmul.f32 %v4460_v9, %v570_v58  ;;  %v4753_v12 = vpack.i.bf16 %v4735_v0, %v4739_v8  ;;  %v610_v23 = vmul.f32 %v4460_v9, %v572_v45  ;;  %v1752_v62 = vsel %vm1742_vm6, %v4107_v10, %v3045_v43 }
 0x1d0   : > { %v1753_v33 = vsel %vm1742_vm6, %v4103_v21, %v3084_v16  ;;  %v1784_v41 = vsel %vm1774_vm7, %v1752_v62, %v3060_v11  ;;  %v742_v19 = vsel %vm714_vm1, %v709_v20, %v693_v49  ;;  %v4773_v21 = vpack.i.bf16 %v4598_v14, %v4596_v1 }
 0x1d1   : > { %3342 = vrot.lane.b32.xlu0 %v4716_v37, %s3600_s30  ;;  %v1785_v56 = vsel %vm1774_vm7, %v1753_v33, %v3099_v32  ;;  %v1817_v36 = vsel %vm1806_vm8, %v1784_v41, %v3104_v34  ;;  %v645_v10 = vadd.f32 %v4418_v48, %v609_v47  ;;  %v3095_v15 = vunpack.i.h.bf16 %v4608_v25 }
 0x1d2   : > { %v1818_v9 = vsel %vm1806_vm8, %v1785_v56, %v3105_v29  ;;  %v3094_v43 = vunpack.i.l.bf16 %v4608_v25  ;;  %v646_v16 = vadd.f32 %v4418_v48, %v610_v23  ;;  %v4784_v45 = vsel %vm714_vm1, %v693_v49, %v709_v20  ;;  %v4802_v20 = vld [vmem:[%s5534_s5] ss:$0 sm:$0xff] }
 0x1d3   : > { %v4747_v57 = vpop.permute.xlu0 %3132  ;;  %v4788_v32 = vsel %vm749_vm3, %v742_v19, 0.0  ;;  %v1850_v1 = vsel %vm437_vm0, %v1818_v9, %v3095_v15  ;;  %v3120_v48 = vunpack.i.h.bf16 %v4575_v28  ;;  %v3119_v29 = vunpack.i.l.bf16 %v4575_v28 }
 0x1d4   : > { %3347 = vrot.lane.b32.xlu1 %v3346_v54, %s3601_s11  ;;  %v1849_v14 = vsel %vm437_vm0, %v1817_v36, %v3094_v43  ;;  %v4793_v54 = vpack.i.bf16 %v4674_v52, %v832_v4  ;;  %v4797_v34 = vmax.f32 %v645_v10, 0.0  ;;  %v4808_v52 = vpack.i.bf16 %v4784_v45, %v4788_v32 }
 0x1d5   : > { %3357 = vrot.lane.b32.xlu2 %v4753_v12, %s3602_s27  ;;  %v4810_v4 = vmax.f32 %v646_v16, 0.0  ;;  %v3085_v28 = vunpack.i.h.bf16 %v4519_v24  ;;  %v3129_v62 = vunpack.i.l.bf16 %v4710_v3  ;;  %v1882_v33 = vsel %vm1871_vm9, %v1849_v14, %v3119_v29 }
 0x1d6   : > { %v4764_v58 = vpop.permute.xlu1 %3137  ;;  %v1883_v41 = vsel %vm1871_vm9, %v1850_v1, %v3120_v48  ;;  %v3154_v56 = vunpack.i.l.bf16 %v4645_v61  ;;  %v3130_v19 = vunpack.i.h.bf16 %v4710_v3  ;;  %v3155_v24 = vunpack.i.h.bf16 %v4645_v61  ;;  %v4830_v3 = vld [vmem:[%s5535_s6] ss:$0 sm:$0xff] }
 0x1d7   : > { %v4777_v11 = vpop.permute.xlu2 %3192  ;;  %v3124_v15 = vunpack.i.l.bf16 %v4694_v7  ;;  %v697_v16 = vrot.slane %v4797_v34, 7  ;;  %v713_v61 = vrot.slane %v4810_v4, 7  ;;  %v3140_v46 = vunpack.i.h.bf16 %v4764_v58 }
 0x1d9   : > { %3367 = vrot.lane.b32.xlu0 %v4773_v21, %s3603_s12  ;;  %v2101_v25 = vpop.f32.mrf.mxu1 }
 0x1da   : > { %v2185_v1 = vmul.f32 %v4802_v20, %v2101_v25  ;;  %v3100_v25 = vunpack.i.h.bf16 %v4622_v59  ;;  %v746_v59 = vsel %vm714_vm1, %v713_v61, %v697_v16 }
 0x1db   : > { %v3148_v49 = vpop.permute.xlu0 %3147 }
 0x1dc   : > { %v3150_v47 = vunpack.i.h.bf16 %v3148_v49  ;;  %v3149_v23 = vunpack.i.l.bf16 %v3148_v49  ;;  %3372 = vrot.lane.b32.xlu1 %v4793_v54, %s3604_s26  ;;  %v3139_v49 = vunpack.i.l.bf16 %v4764_v58  ;;  %v3194_v58 = vunpack.i.l.bf16 %v4777_v11 }
 0x1dd   : > { %3362 = vrot.lane.b32.xlu2 %v4808_v52, %s3605_s15 }
 0x1de   : > { %v1916_v9 = vsel %vm1904_vm10, %v1883_v41, %v3150_v47  ;;  %v1915_v36 = vsel %vm1904_vm10, %v1882_v33, %v3149_v23  ;;  %v3158_v10 = vpop.permute.xlu1 %3157 }
 0x1df   : > { %v1948_v43 = vsel %vm1937_vm11, %v1915_v36, %v3129_v62  ;;  %v4832_v14 = vpop.permute.xlu2 %3202  ;;  %v1949_v48 = vsel %vm1937_vm11, %v1916_v9, %v3130_v19  ;;  %v4844_v62 = vpack.i.bf16 %v4724_v38, %v4631_v27  ;;  %v1754_v19 = vsel %vm1742_vm6, %v4171_v42, %v3085_v28 }
 0x1e0   : > { %v1981_v29 = vsel %vm1970_vm12, %v1948_v43, %v3154_v56  ;;  %v1982_v23 = vsel %vm1970_vm12, %v1949_v48, %v3155_v24  ;;  %v1755_v9 = vsel %vm1742_vm6, %v4167_v18, %v3124_v15  ;;  %v3145_v27 = vunpack.i.h.bf16 %v4613_v51 }
 0x1e1   : > { %3387 = vrot.lane.b32.xlu0 %v3921_v50, %s3600_s30  ;;  %v2103_v47 = vpop.f32.mrf.mxu1  ;;  %v2008_v41 = vpack.c.bf16 %v1982_v23, %v1981_v29  ;;  %v2221_v50 = vadd.f32 %v4830_v3, %v2185_v1  ;;  %v1787_v38 = vsel %vm1774_vm7, %v1755_v9, %v3139_v49  ;;  %v4862_v42 = vpack.i.bf16 %v4810_v4, %v4797_v34 }
 0x1e2   : > { %v2186_v33 = vmul.f32 %v4802_v20, %v2103_v47  ;;  %v3144_v18 = vunpack.i.l.bf16 %v4613_v51  ;;  %v1786_v28 = vsel %vm1774_vm7, %v1754_v19, %v3100_v25  ;;  %v802_v15 = vrot.slane %v4797_v34, 1 }
 0x1e3   : > { %v3168_v56 = vpop.permute.xlu0 %3167  ;;  %2741 = vmatmul.msk.bf16.gmra.mxu1 %vm2039_vm13, %v2008_v41  ;;  %v818_v43 = vrot.slane %v4810_v4, 1  ;;  %v3134_v1 = vunpack.i.l.bf16 %v4747_v57  ;;  %v730_v29 = vsel %vm714_vm1, %v697_v16, %v713_v61  ;;  %v785_v51 = vsel %vm749_vm3, %v746_v59, 0.0 }
 0x1e4   : > { %3377 = vrot.lane.b32.xlu1 %v4844_v62, %s3606_s22  ;;  %v2222_v36 = vadd.f32 %v4830_v3, %v2186_v33  ;;  %v1820_v49 = vsel %vm1806_vm8, %v1787_v38, %v3145_v27  ;;  %v2253_v25 = vmax.f32 %v2221_v50, 0.0  ;;  %v3160_v47 = vunpack.i.h.bf16 %v3158_v10 }
 0x1e5   : > { %3382 = vrot.lane.b32.xlu2 %v3999_v39, %s3602_s27  ;;  %v3159_v39 = vunpack.i.l.bf16 %v3158_v10  ;;  %v3135_v34 = vunpack.i.h.bf16 %v4747_v57  ;;  %v1819_v4 = vsel %vm1806_vm8, %v1786_v28, %v3144_v18  ;;  %v4886_v41 = vpack.i.bf16 %v730_v29, %v785_v51 }
 0x1e6   : > { %v4868_v24 = vpop.permute.xlu1 %3162  ;;  %v2254_v48 = vmax.f32 %v2222_v36, 0.0  ;;  %v1851_v16 = vsel %vm437_vm0, %v1819_v4, %v3134_v1  ;;  %v851_v10 = vsel %vm819_vm2, %v818_v43, %v802_v15  ;;  %v3170_v9 = vunpack.i.h.bf16 %v3168_v56 }
 0x1e7   : > { %v4878_v23 = vpop.permute.xlu2 %3222  ;;  %v1852_v53 = vsel %vm437_vm0, %v1820_v49, %v3135_v34  ;;  %v1884_v19 = vsel %vm1871_vm9, %v1851_v16, %v3159_v39  ;;  %v3169_v50 = vunpack.i.l.bf16 %v3168_v56  ;;  %v3185_v59 = vunpack.i.h.bf16 %v4727_v6 }
 0x1e8   : > { %v2285_v33 = vpack.c.bf16 %v2254_v48, %v2253_v25  ;;  %v1885_v57 = vsel %vm1871_vm9, %v1852_v53, %v3160_v47  ;;  %v3184_v27 = vunpack.i.l.bf16 %v4727_v6  ;;  %v3164_v38 = vunpack.i.l.bf16 %v4868_v24 }
 0x1e9   : > { %3402 = vrot.lane.b32.xlu0 %v4862_v42, %s3603_s12  ;;  %v835_v18 = vsel %vm819_vm2, %v802_v15, %v818_v43  ;;  %v891_v56 = vsel %vm857_vm4, %v851_v10, 0.0  ;;  %v3125_v6 = vunpack.i.h.bf16 %v4694_v7  ;;  %v3179_v47 = vunpack.i.l.bf16 %v4682_v55 }
 0x1ea   : > { %2752 = vmatmul.msk.bf16.vlgmr.msra.gmra.mxu2 %vm1742_vm6, %v2285_v33  ;;  %v1917_v28 = vsel %vm1904_vm10, %v1884_v19, %v3184_v27  ;;  %v1757_v43 = vsel %vm1742_vm6, %v4245_v30, %v3164_v38  ;;  %v3406_v7 = vpack.i.bf16 %v891_v56, %v835_v18  ;;  %v3195_v30 = vunpack.i.h.bf16 %v4777_v11 }
 0x1eb   : > { %v3173_v61 = vpop.permute.xlu0 %3172  ;;  %v1950_v29 = vsel %vm1937_vm11, %v1917_v28, %v3169_v50  ;;  %v1756_v34 = vsel %vm1742_vm6, %v4249_v2, %v3125_v6  ;;  %v1789_v4 = vsel %vm1774_vm7, %v1757_v43, %v3179_v47  ;;  %v3224_v27 = vunpack.i.l.bf16 %v4878_v23 }
 0x1ec   : > { %3392 = vrot.lane.b32.xlu1 %v3934_v60, %s3604_s26  ;;  %v1918_v60 = vsel %vm1904_vm10, %v1885_v57, %v3185_v59  ;;  %v3175_v33 = vunpack.i.h.bf16 %v3173_v61  ;;  %v3174_v16 = vunpack.i.l.bf16 %v3173_v61  ;;  %v1822_v57 = vsel %vm1806_vm8, %v1789_v4, %v3195_v30 }
 0x1ed   : > { %3397 = vrot.lane.b32.xlu2 %v4886_v41, %s3605_s15  ;;  %v1951_v51 = vsel %vm1937_vm11, %v1918_v60, %v3170_v9  ;;  %v3225_v59 = vunpack.i.h.bf16 %v4878_v23 }
 0x1ee   : > { %v3188_v36 = vpop.permute.xlu1 %3187  ;;  %v1854_v61 = vsel %vm437_vm0, %v1822_v57, %v3175_v33 }
 0x1ef   : > { %v3190_v1 = vunpack.i.h.bf16 %v3188_v36  ;;  %v3189_v48 = vunpack.i.l.bf16 %v3188_v36  ;;  %v4909_v49 = vpop.permute.xlu2 %3232 }
 0x1f1   : > { %3417 = vrot.lane.b32.xlu0 %v4773_v21, %s3600_s30  ;;  %v1983_v63 = vsel %vm1970_vm12, %v1950_v29, %v3189_v48  ;;  %v1984_v15 = vsel %vm1970_vm12, %v1951_v51, %v3190_v1  ;;  %v1788_v21 = vsel %vm1774_vm7, %v1756_v34, %v3140_v46 }
 0x1f2   : > { %v2009_v25 = vpack.c.bf16 %v1984_v15, %v1983_v63  ;;  %v1821_v19 = vsel %vm1806_vm8, %v1788_v21, %v3194_v58  ;;  %v3204_v63 = vunpack.i.l.bf16 %v4832_v14  ;;  %v3165_v15 = vunpack.i.h.bf16 %v4868_v24 }
 0x1f3   : > { %v3208_v39 = vpop.permute.xlu0 %3207  ;;  %v1853_v50 = vsel %vm437_vm0, %v1821_v19, %v3174_v16  ;;  %v3235_v24 = vunpack.i.h.bf16 %v4909_v49  ;;  %v3234_v58 = vunpack.i.l.bf16 %v4909_v49  ;;  %v3180_v21 = vunpack.i.h.bf16 %v4682_v55 }
 0x1f4   : > { %3407 = vrot.lane.b32.xlu1 %v3406_v7, %s3606_s22  ;;  %2742 = vmatmul.msk.bf16.gmra.mxu1 %vm2039_vm13, %v2009_v25  ;;  %v3210_v56 = vunpack.i.h.bf16 %v3208_v39  ;;  %v3209_v28 = vunpack.i.l.bf16 %v3208_v39  ;;  %v5582_v25 = vmov 0.0   ;;  %v1758_v34 = vsel %vm1742_vm6, %v4320_v40, %v3165_v15 }
 0x1f5   : > { %3412 = vrot.lane.b32.xlu2 %v4808_v52, %s3602_s27 }
 0x1f6   : > { %v3198_v53 = vpop.permute.xlu1 %3197 }
 0x1f7   : > { %v3200_v10 = vunpack.i.h.bf16 %v3198_v53  ;;  %v3199_v2 = vunpack.i.l.bf16 %v3198_v53  ;;  %v4931_v9 = vpop.permute.xlu2 %3262 }
 0x1f9   : > { %3427 = vrot.lane.b32.xlu0 %v4716_v37, %s3603_s12  ;;  %v1886_v11 = vsel %vm1871_vm9, %v1853_v50, %v3199_v2  ;;  %v1887_v52 = vsel %vm1871_vm9, %v1854_v61, %v3200_v10 }
 0x1fa   : > { %v1919_v36 = vsel %vm1904_vm10, %v1886_v11, %v3224_v27  ;;  %v1920_v18 = vsel %vm1904_vm10, %v1887_v52, %v3225_v59  ;;  %v3264_v59 = vunpack.i.l.bf16 %v4931_v9 }
 0x1fb   : > { %v3213_v38 = vpop.permute.xlu0 %3212  ;;  %v1952_v23 = vsel %vm1937_vm11, %v1919_v36, %v3209_v28  ;;  %v1953_v6 = vsel %vm1937_vm11, %v1920_v18, %v3210_v56  ;;  %v3265_v36 = vunpack.i.h.bf16 %v4931_v9 }
 0x1fc   : > { %3422 = vrot.lane.b32.xlu1 %v4844_v62, %s3604_s26  ;;  %v3214_v4 = vunpack.i.l.bf16 %v3213_v38  ;;  %v3215_v10 = vunpack.i.h.bf16 %v3213_v38 }
 0x1fd   : > { %3432 = vrot.lane.b32.xlu2 %v4753_v12, %s3605_s15 }
 0x1fe   : > { %v3228_v37 = vpop.permute.xlu1 %3227 }
 0x1ff   : > { %v3230_v60 = vunpack.i.h.bf16 %v3228_v37  ;;  %v3229_v1 = vunpack.i.l.bf16 %v3228_v37  ;;  %v4947_v48 = vpop.permute.xlu2 %3272 }
 0x201   : > { %3442 = vrot.lane.b32.xlu0 %v4862_v42, %s3600_s30  ;;  %v1985_v62 = vsel %vm1970_vm12, %v1952_v23, %v3229_v1  ;;  %v1986_v29 = vsel %vm1970_vm12, %v1953_v6, %v3230_v60  ;;  %s2622_s30 = scalar_lea.hbm %s5539_s10, %s2777_s24 }
 0x202   : > { %v2010_v51 = vpack.c.bf16 %v1986_v29, %v1985_v62 }
 0x203   : > { %v4955_v46 = vpop.permute.xlu0 %3217 }
 0x204   : > { %3447 = vrot.lane.b32.xlu1 %v4793_v54, %s3606_s22  ;;  %2743 = vmatmul.msk.bf16.gmra.mxu1 %vm2039_vm13, %v2010_v51  ;;  %v3219_v42 = vunpack.i.l.bf16 %v4955_v46  ;;  %v1759_v54 = vsel %vm1742_vm6, %v4316_v31, %v3204_v63 }
 0x205   : > { %3437 = vrot.lane.b32.xlu2 %v4886_v41, %s3602_s27  ;;  %s2625_s27 = sshll.u32 %s2622_s30, 4  ;;  %s2626_s27 = int_to_ptr.hbm [resolvable:$true] %s2625_s27 }
 0x206   : > { %v3238_v12 = vpop.permute.xlu1 %3237  ;;  %v1791_v39 = vsel %vm1774_vm7, %v1759_v54, %v3219_v42 }
 0x207   : > { %v4965_v43 = vpop.permute.xlu2 %3297  ;;  %v1824_v16 = vsel %vm1806_vm8, %v1791_v39, %v3235_v24  ;;  %v3239_v30 = vunpack.i.l.bf16 %v3238_v12  ;;  %v3240_v2 = vunpack.i.h.bf16 %v3238_v12 }
 0x208   : > { %v1856_v57 = vsel %vm437_vm0, %v1824_v16, %v3215_v10 }
 0x209   : > { %1616 = vrot.lane.b32.xlu0 %v5582_v25, %s3603_s12  ;;  %v1889_v27 = vsel %vm1871_vm9, %v1856_v57, %v3240_v2  ;;  %s2611_s12 = scalar_lea.sflag [#allocation4], %s3749_s18 }
 0x20a   : > { %v1922_v6 = vsel %vm1904_vm10, %v1889_v27, %v3265_v36 }
 0x20b   : > { %v4971_v47 = vpop.permute.xlu0 %3242 }
 0x20c   : > { %v3245_v41 = vunpack.i.h.bf16 %v4971_v47  ;;  %3452 = vrot.lane.b32.xlu1 %v3406_v7, %s3604_s26  ;;  %v1790_v7 = vsel %vm1774_vm7, %v1758_v34, %v3180_v21  ;;  %v3205_v34 = vunpack.i.h.bf16 %v4832_v14  ;;  %v3244_v24 = vunpack.i.l.bf16 %v4971_v47  ;;  %s3542_s26 = sshra.s32 %s2626_s27, 4  ;;  %s3543_s26 = int_to_ptr.hbm [resolvable:$true] %s3542_s26 }
 0x20d   : > { %1523 = vrot.lane.b32.xlu2 %v5582_v25, %s3605_s15  ;;  %v1823_v49 = vsel %vm1806_vm8, %v1790_v7, %v3234_v58  ;;  %v3220_v21 = vunpack.i.h.bf16 %v4955_v46  ;;  %v3274_v46 = vunpack.i.l.bf16 %v4947_v48  ;;  %s5249_s15 = scalar_lea.vmem [#allocation5], %s2706_s19  ;;  %s3544_s19 = scalar_lea.hbm %s3543_s26, 256 }
 0x20e   : > { %v2106_v33 = vpop.f32.mrf.mxu1  ;;  %v3258_v31 = vpop.permute.xlu1 %3257  ;;  %v1762_v40 = vsel %vm1742_vm6, %v4487_v13, %v3245_v41  ;;  %v1855_v19 = vsel %vm437_vm0, %v1823_v49, %v3214_v4  ;;  %v1760_v16 = vsel %vm1742_vm6, %v4413_v5, %v3205_v34  ;;  %s2623_s17 = sshll.u32 %s5249_s15, 4  ;;  %p3545_p6 = scmp.ne.s32.totalorder %s3543_s26, %s3544_s19  ;;  %s2624_s17 = int_to_ptr.vmem [resolvable:$true] %s2623_s17 }
 0x20f   : > { %v3260_v53 = vunpack.i.h.bf16 %v3258_v31  ;;  %v1888_v50 = vsel %vm1871_vm9, %v1855_v19, %v3239_v30  ;;  %v2187_v61 = vmul.f32 %v4802_v20, %v2106_v33  ;;  %v4995_v11 = vpop.permute.xlu2 %3302  ;;  %v3259_v4 = vunpack.i.l.bf16 %v3258_v31  ;;  %p3549_p0 = scmp.lt.s32.totalorder %s3543_s26, %s5539_s10  ;;  %p3550_p1 = scmp.lt.s32.totalorder %s3548_s23, %s3544_s19 }
 0x210   : > { %v1921_v18 = vsel %vm1904_vm10, %v1888_v50, %v3264_v59  ;;  %v3275_v30 = vunpack.i.h.bf16 %v4947_v48  ;;  %v1792_v7 = vsel %vm1774_vm7, %v1760_v16, %v3220_v21  ;;  %v3300_v19 = vunpack.i.h.bf16 %v4965_v43  ;;  %p3546_p9 = pnand %p3545_p6, %p3713_p11 }
 0x211   : > { %v4989_v55 = vsel %vm1774_vm7, %v1762_v40, %v3260_v53  ;;  %v2223_v37 = vadd.f32 %v4830_v3, %v2187_v61  ;;  %v1761_v53 = vsel %vm1742_vm6, %v4409_v22, %v3244_v24  ;;  %v1825_v57 = vsel %vm1806_vm8, %v1792_v7, %v3274_v46  ;;  %p3551_p3 = por %p3550_p1, %p3549_p0 }
 0x212   : > { %v1793_v10 = vsel %vm1774_vm7, %v1761_v53, %v3259_v4  ;;  %v2885_v46 = vunpack.i.h.bf16 %v4070_v44  ;;  %p3547_p13 = pneg %p3546_p9 }
 0x213   : > { %v3248_v52 = vpop.permute.xlu0 %3247  ;;  %v2255_v63 = vmax.f32 %v2223_v37, 0.0  ;;  %v1826_v50 = vsel %vm1806_vm8, %v1793_v10, %v3275_v30 }
 0x214   : > { %v3249_v13 = vunpack.i.l.bf16 %v3248_v52  ;;  %1709 = vrot.lane.b32.xlu1 %v5582_v25, %s3606_s22  ;;  %v3250_v38 = vunpack.i.h.bf16 %v3248_v52  ;;  %p3552_p4 = pnand %p3551_p3, %p3547_p13 }
 0x216   : > { %v2108_v56 = vpop.f32.mrf.mxu1  ;;  %v3268_v28 = vpop.permute.xlu1 %3267  ;;  %v1954_v62 = vsel %vm1937_vm11, %v1921_v18, %v3249_v13  ;;  %v1955_v29 = vsel %vm1937_vm11, %v1922_v6, %v3250_v38 }
 0x217   : > { %v2188_v60 = vmul.f32 %v4802_v20, %v2108_v56  ;;  %v3270_v1 = vunpack.i.h.bf16 %v3268_v28  ;;  %v3269_v23 = vunpack.i.l.bf16 %v3268_v28  ;;  %v5011_v54 = vpop.permute.xlu2 %3312 }
 0x219   : > { %v2224_v51 = vadd.f32 %v4830_v3, %v2188_v60  ;;  %v1987_v9 = vsel %vm1970_vm12, %v1954_v62, %v3269_v23  ;;  %v1988_v12 = vsel %vm1970_vm12, %v1955_v29, %v3270_v1  ;;  %v3305_v60 = vunpack.i.h.bf16 %v4995_v11 }
 0x21a   : > { %v2011_v25 = vpack.c.bf16 %v1988_v12, %v1987_v9  ;;  %v3304_v1 = vunpack.i.l.bf16 %v4995_v11 }
 0x21b   : > { %v2256_v42 = vmax.f32 %v2224_v51, 0.0  ;;  %v3253_v15 = vpop.permute.xlu0 %3252 }
 0x21c   : > { %2744 = vmatmul.msk.bf16.gmra.mxu1 %vm2039_vm13, %v2011_v25  ;;  %v3254_v14 = vunpack.i.l.bf16 %v3253_v15  ;;  %v3255_v31 = vunpack.i.h.bf16 %v3253_v15 }
 0x21d   : > { %v2286_v39 = vpack.c.bf16 %v2256_v42, %v2255_v63 }
 0x21e   : > { %v3278_v41 = vpop.permute.xlu1 %3277  ;;  %v1857_v59 = vsel %vm437_vm0, %v1825_v57, %v3254_v14  ;;  %v1858_v38 = vsel %vm437_vm0, %v1826_v50, %v3255_v31  ;;  %v2884_v31 = vunpack.i.l.bf16 %v4070_v44  ;;  %v5584_v57 = vld [vmem:[#allocation14_spill] sm:$0xff] }
 0x21f   : > { %2753 = vmatmul.msk.bf16.gmra.mxu2 %vm1742_vm6, %v2286_v39  ;;  %v3279_v49 = vunpack.i.l.bf16 %v3278_v41  ;;  %v5029_v2 = vpop.permute.xlu2 %3322  ;;  %v3280_v22 = vunpack.i.h.bf16 %v3278_v41  ;;  %v2870_v50 = vunpack.i.h.bf16 %v5584_v57 }
 0x220   : > { %v2111_v58 = vpop.f32.mrf.mxu1 }
 0x221   : > { %v2189_v47 = vmul.f32 %v4802_v20, %v2111_v58  ;;  %v1890_v36 = vsel %vm1871_vm9, %v1857_v59, %v3279_v49  ;;  %v1891_v56 = vsel %vm1871_vm9, %v1858_v38, %v3280_v22  ;;  %v5583_v49 = vld [vmem:[#allocation13_spill] sm:$0xff]  ;;  %v2869_v59 = vunpack.i.l.bf16 %v5584_v57 }
 0x222   : > { %v1923_v29 = vsel %vm1904_vm10, %v1890_v36, %v3304_v1  ;;  %v1924_v51 = vsel %vm1904_vm10, %v1891_v56, %v3305_v60  ;;  %v2894_v22 = vunpack.i.l.bf16 %v5583_v49  ;;  %v5587_v1 = vld [vmem:[#allocation17_spill] sm:$0xff] }
 0x223   : > { %v3288_v33 = vpop.permute.xlu0 %3287  ;;  %v2225_v48 = vadd.f32 %v4830_v3, %v2189_v47 }
 0x224   : > { %v3290_v28 = vunpack.i.h.bf16 %v3288_v33 }
 0x225   : > { %v2257_v23 = vmax.f32 %v2225_v48, 0.0  ;;  %v5585_v48 = vld [vmem:[#allocation15_spill] sm:$0xff] }
 0x226   : > { %v5026_v40 = vpop.permute.xlu1 %3282  ;;  %v1957_v42 = vsel %vm1937_vm11, %v1924_v51, %v3290_v28  ;;  %v2874_v56 = vunpack.i.l.bf16 %v5585_v48  ;;  %v5586_v28 = vld [vmem:[#allocation16_spill] sm:$0xff] }
 0x227   : > { %v3285_v5 = vunpack.i.h.bf16 %v5026_v40  ;;  %v5055_v25 = vpop.permute.xlu2 %3352  ;;  %v3284_v38 = vunpack.i.l.bf16 %v5026_v40 }
 0x228   : > { %v2113_v52 = vpop.f32.mrf.mxu1 }
 0x229   : > { %v1764_v61 = vsel %vm1742_vm6, %v4588_v35, %v3285_v5  ;;  %v2190_v13 = vmul.f32 %v4802_v20, %v2113_v52  ;;  %v3289_v35 = vunpack.i.l.bf16 %v3288_v33  ;;  %v2895_v5 = vunpack.i.h.bf16 %v5583_v49 }
 0x22a   : > { %v5041_v27 = vsel %vm1774_vm7, %v1764_v61, %v3300_v19  ;;  %v3354_v61 = vunpack.i.l.bf16 %v5055_v25 }
 0x22b   : > { %v5045_v18 = vpop.permute.xlu0 %3292  ;;  %v2226_v37 = vadd.f32 %v4830_v3, %v2190_v13  ;;  %v1956_v63 = vsel %vm1937_vm11, %v1923_v29, %v3289_v35  ;;  %v2875_v13 = vunpack.i.h.bf16 %v5585_v48  ;;  %v2890_v35 = vunpack.i.h.bf16 %v5586_v28 }
 0x22c   : > { %v3315_v48 = vunpack.i.h.bf16 %v5011_v54 }
 0x22d   : > { %v2258_v6 = vmax.f32 %v2226_v37, 0.0  ;;  %v2889_v37 = vunpack.i.l.bf16 %v5586_v28 }
 0x22e   : > { %v3308_v62 = vpop.permute.xlu1 %3307 }
 0x22f   : > { %v3310_v9 = vunpack.i.h.bf16 %v3308_v62  ;;  %v3309_v12 = vunpack.i.l.bf16 %v3308_v62  ;;  %v2287_v15 = vpack.c.bf16 %v2258_v6, %v2257_v23  ;;  %v5068_v30 = vpop.permute.xlu2 %3357  ;;  %v2900_v23 = vunpack.i.h.bf16 %v5587_v1  ;;  %v5588_v62 = vld [vmem:[#allocation18_spill] sm:$0xff] }
 0x230   : > { %v2899_v6 = vunpack.i.l.bf16 %v5587_v1  ;;  %v2960_v29 = vunpack.i.h.bf16 %v5588_v62 }
 0x231   : > { %v2116_v39 = vpop.f32.mrf.mxu1  ;;  %v1989_v41 = vsel %vm1970_vm12, %v1956_v63, %v3309_v12  ;;  %v1990_v11 = vsel %vm1970_vm12, %v1957_v42, %v3310_v9  ;;  %2754 = vmatmul.msk.bf16.gmra.mxu2 %vm1742_vm6, %v2287_v15  ;;  %v5589_v9 = vld [vmem:[#allocation20_spill] sm:$0xff]  ;;  %v5590_v15 = vld [vmem:[#allocation21_spill] sm:$0xff] }
 0x232   : > { %v2012_v34 = vpack.c.bf16 %v1990_v11, %v1989_v41  ;;  %v2191_v58 = vmul.f32 %v4802_v20, %v2116_v39  ;;  %v2965_v12 = vunpack.i.h.bf16 %v5589_v9  ;;  %v2945_v39 = vunpack.i.h.bf16 %v5590_v15 }
 0x233   : > { %v5060_v24 = vpop.permute.xlu0 %3327  ;;  %v1763_v41 = vsel %vm1742_vm6, %v4483_v17, %v3284_v38 }
 0x234   : > { %2745 = vmatmul.msk.bf16.gmra.mxu1 %vm2039_vm13, %v2012_v34  ;;  %v2227_v33 = vadd.f32 %v4830_v3, %v2191_v58 }
 0x236   : > { %v5064_v21 = vpop.permute.xlu1 %3317  ;;  %v2259_v10 = vmax.f32 %v2227_v33, 0.0  ;;  %v3299_v33 = vunpack.i.l.bf16 %v4965_v43 }
 0x237   : > { %v5100_v11 = vpop.permute.xlu2 %3362 }
 0x239   : > { %v2118_v4 = vpop.f32.mrf.mxu1 }
 0x23a   : > { %v2192_v16 = vmul.f32 %v4802_v20, %v2118_v4  ;;  %v2964_v4 = vunpack.i.l.bf16 %v5589_v9  ;;  %v3295_v9 = vunpack.i.h.bf16 %v5045_v18 }
 0x23b   : > { %v3333_v53 = vpop.permute.xlu0 %3332 }
 0x23c   : > { %v2228_v7 = vadd.f32 %v4830_v3, %v2192_v16  ;;  %v3335_v63 = vunpack.i.h.bf16 %v3333_v53  ;;  %v3334_v34 = vunpack.i.l.bf16 %v3333_v53  ;;  %v3314_v16 = vunpack.i.l.bf16 %v5011_v54 }
 0x23d   : > { %v3330_v53 = vunpack.i.h.bf16 %v5060_v24  ;;  %v3360_v54 = vunpack.i.h.bf16 %v5068_v30 }
 0x23e   : > { %v2260_v14 = vmax.f32 %v2228_v7, 0.0  ;;  %v5071_v47 = vpop.permute.xlu1 %3337 }
 0x23f   : > { %v3339_v19 = vunpack.i.l.bf16 %v5071_v47 }
 0x240   : > { %v2288_v52 = vpack.c.bf16 %v2260_v14, %v2259_v10  ;;  %v3325_v14 = vunpack.i.h.bf16 %v5029_v2 }
 0x241   : > { %v1769_v36 = vsel %vm1742_vm6, %v4735_v0, %v3339_v19  ;;  %v2959_v0 = vunpack.i.l.bf16 %v5588_v62  ;;  %v1795_v19 = vsel %vm1774_vm7, %v1763_v41, %v3299_v33 }
 0x242   : > { %v1801_v60 = vsel %vm1774_vm7, %v1769_v36, %v3354_v61  ;;  %2755 = vmatmul.msk.bf16.gmra.mxu2 %vm1742_vm6, %v2288_v52  ;;  %v1768_v61 = vsel %vm1742_vm6, %v4739_v8, %v3335_v63  ;;  %v2944_v52 = vunpack.i.l.bf16 %v5590_v15  ;;  %v1827_v36 = vsel %vm1806_vm8, %v4989_v55, %v3314_v16 }
 0x243   : > { %v1834_v40 = vsel %vm1806_vm8, %v1801_v60, %v2895_v5  ;;  %v3343_v51 = vpop.permute.xlu0 %3342  ;;  %v3294_v60 = vunpack.i.l.bf16 %v5045_v18  ;;  %v1828_v62 = vsel %vm1806_vm8, %v1795_v19, %v3315_v48 }
 0x244   : > { %v1866_v42 = vsel %vm437_vm0, %v1834_v40, %v2875_v13  ;;  %v1767_v13 = vsel %vm1742_vm6, %v4784_v45, %v3334_v34  ;;  %v3345_v41 = vunpack.i.h.bf16 %v3343_v51 }
 0x245   : > { %v1899_v58 = vsel %vm1871_vm9, %v1866_v42, %v2900_v23  ;;  %v1766_v23 = vsel %vm1742_vm6, %v4788_v32, %v3325_v14  ;;  %v3319_v42 = vunpack.i.l.bf16 %v5064_v21 }
 0x246   : > { %v3348_v7 = vpop.permute.xlu1 %3347  ;;  %v1932_v10 = vsel %vm1904_vm10, %v1899_v58, %v2960_v29  ;;  %v1798_v55 = vsel %vm1774_vm7, %v1766_v23, %v3330_v53  ;;  %v5141_v58 = vpop.permute.xlu2 %3382 }
 0x247   : > { %v3350_v49 = vunpack.i.h.bf16 %v3348_v7  ;;  %v3349_v5 = vunpack.i.l.bf16 %v3348_v7  ;;  %v1965_v17 = vsel %vm1937_vm11, %v1932_v10, %v2945_v39  ;;  %v1859_v39 = vsel %vm437_vm0, %v1827_v36, %v3294_v60 }
 0x248   : > { %v5114_v43 = vsel %vm1970_vm12, %v1965_v17, %v2965_v12  ;;  %v3344_v12 = vunpack.i.l.bf16 %v3343_v51  ;;  %v1860_v51 = vsel %vm437_vm0, %v1828_v62, %v3295_v9  ;;  %v1892_v14 = vsel %vm1871_vm9, %v1859_v39, %v3319_v42  ;;  %v5591_v42 = vld [vmem:[#allocation12_spill] sm:$0xff] }
 0x249   : > { %v1800_v38 = vsel %vm1774_vm7, %v1768_v61, %v3350_v49  ;;  %v1799_v1 = vsel %vm1774_vm7, %v1767_v13, %v3349_v5  ;;  %v3365_v17 = vunpack.i.h.bf16 %v5100_v11  ;;  %v3364_v61 = vunpack.i.l.bf16 %v5100_v11 }
 0x24a   : > { %v1833_v8 = vsel %vm1806_vm8, %v1800_v38, %v2894_v22  ;;  %v3359_v22 = vunpack.i.l.bf16 %v5068_v30  ;;  %v1832_v32 = vsel %vm1806_vm8, %v1799_v1, %v3360_v54  ;;  %v3355_v39 = vunpack.i.h.bf16 %v5055_v25  ;;  %v5592_v25 = vld [vmem:[#allocation23_spill] sm:$0xff] }
 0x24b   : > { %v1865_v45 = vsel %vm437_vm0, %v1833_v8, %v2874_v56  ;;  %v2121_v29 = vpop.f32.mrf.mxu1  ;;  %v3368_v40 = vpop.permute.xlu0 %3367  ;;  %v3320_v56 = vunpack.i.h.bf16 %v5064_v21  ;;  %v1864_v10 = vsel %vm437_vm0, %v1832_v32, %v3345_v41  ;;  %v3385_v41 = vunpack.i.h.bf16 %v5141_v58 }
 0x24c   : > { %v1898_v63 = vsel %vm1871_vm9, %v1865_v45, %v2899_v6  ;;  %v1831_v6 = vsel %vm1806_vm8, %v1798_v55, %v3359_v22 }
 0x24d   : > { %v1931_v15 = vsel %vm1904_vm10, %v1898_v63, %v2959_v0  ;;  %v1863_v7 = vsel %vm437_vm0, %v1831_v6, %v3344_v12  ;;  %v2193_v0 = vmul.f32 %v4802_v20, %v2121_v29  ;;  %v3340_v63 = vunpack.i.h.bf16 %v5071_v47 }
 0x24e   : > { %v3373_v34 = vpop.permute.xlu1 %3372  ;;  %v1964_v18 = vsel %vm1937_vm11, %v1931_v15, %v2944_v52  ;;  %v3398_v28 = vpop.permute.xlu2 %3397 }
 0x24f   : > { %v3375_v33 = vunpack.i.h.bf16 %v3373_v34  ;;  %v3374_v30 = vunpack.i.l.bf16 %v3373_v34  ;;  %v5145_v16 = vsel %vm1970_vm12, %v1964_v18, %v2964_v4  ;;  %v1893_v4 = vsel %vm1871_vm9, %v1860_v51, %v3320_v56 }
 0x250   : > { %v2016_v21 = vpack.c.bf16 %v5114_v43, %v5145_v16  ;;  %v3370_v43 = vunpack.i.h.bf16 %v3368_v40  ;;  %v2229_v36 = vadd.f32 %v4830_v3, %v2193_v0  ;;  %v1926_v57 = vsel %vm1904_vm10, %v1893_v4, %v3365_v17 }
 0x251   : > { %v1896_v49 = vsel %vm1871_vm9, %v1863_v7, %v3374_v30  ;;  %v1897_v5 = vsel %vm1871_vm9, %v1864_v10, %v3375_v33  ;;  %v1770_v32 = vsel %vm1742_vm6, %v5591_v42, %v3340_v63  ;;  %v3324_v56 = vunpack.i.l.bf16 %v5029_v2 }
 0x252   : > { %v1929_v19 = vsel %vm1904_vm10, %v1896_v49, %v2884_v31  ;;  %v1930_v53 = vsel %vm1904_vm10, %v1897_v5, %v2885_v46  ;;  %v3369_v31 = vunpack.i.l.bf16 %v3368_v40  ;;  %v2261_v62 = vmax.f32 %v2229_v36, 0.0 }
 0x253   : > { %v2123_v52 = vpop.f32.mrf.mxu1  ;;  %v3388_v48 = vpop.permute.xlu0 %3387  ;;  %v1962_v13 = vsel %vm1937_vm11, %v1929_v19, %v2869_v59  ;;  %v1963_v38 = vsel %vm1937_vm11, %v1930_v53, %v2870_v50  ;;  %v1925_v50 = vsel %vm1904_vm10, %v1892_v14, %v3364_v61  ;;  %v1959_v45 = vsel %vm1937_vm11, %v1926_v57, %v3370_v43 }
 0x254   : > { %v2194_v44 = vmul.f32 %v4802_v20, %v2123_v52  ;;  %v1995_v46 = vsel %vm1970_vm12, %v1962_v13, %v2889_v37  ;;  %v1996_v11 = vsel %vm1970_vm12, %v1963_v38, %v2890_v35  ;;  %v1958_v54 = vsel %vm1937_vm11, %v1925_v50, %v3369_v31 }
 0x255   : > { %v2015_v1 = vpack.c.bf16 %v1996_v11, %v1995_v46  ;;  %v3384_v34 = vunpack.i.l.bf16 %v5141_v58  ;;  %v1802_v6 = vsel %vm1774_vm7, %v1770_v32, %v3355_v39  ;;  %v3390_v33 = vunpack.i.h.bf16 %v3388_v48 }
 0x256   : > { %v2230_v60 = vadd.f32 %v4830_v3, %v2194_v44  ;;  %v3378_v59 = vpop.permute.xlu1 %3377  ;;  %v3413_v15 = vpop.permute.xlu2 %3412  ;;  %v3389_v30 = vunpack.i.l.bf16 %v3388_v48  ;;  %v3329_v7 = vunpack.i.l.bf16 %v5060_v24  ;;  %v1836_v2 = vsel %vm1806_vm8, %v5592_v25, %v3385_v41  ;;  %v3464_v41 = vld [vmem:[%s3755_s28] sm:$0xff] }
 0x257   : > { %v3380_v8 = vunpack.i.h.bf16 %v3378_v59  ;;  %v3379_v23 = vunpack.i.l.bf16 %v3378_v59  ;;  %2748 = vmatmul.msk.bf16.vlgmr.msrb.gmra.mxu3 %vm2039_vm13, %v2015_v1  ;;  %v1835_v51 = vsel %vm1806_vm8, %v1802_v6, %v3384_v34  ;;  %v1765_v58 = vsel %vm1742_vm6, %v4584_v26, %v3324_v56  ;;  %v5217_v26 = vld [vmem:[%s5537_s8] ss:$0 sm:$0xff] }
 0x258   : > { %v2262_v37 = vmax.f32 %v2230_v60, 0.0  ;;  %v1867_v14 = vsel %vm437_vm0, %v1835_v51, %v3389_v30  ;;  %v1868_v49 = vsel %vm437_vm0, %v1836_v2, %v3390_v33  ;;  %v1797_v24 = vsel %vm1774_vm7, %v1765_v58, %v3329_v7  ;;  %v5226_v59 = vld [vmem:[%s5538_s9] ss:$0 sm:$0xff] }
 0x259   : > { %v1991_v35 = vsel %vm1970_vm12, %v1958_v54, %v3379_v23  ;;  %v1992_v29 = vsel %vm1970_vm12, %v1959_v45, %v3380_v8  ;;  %v3400_v53 = vunpack.i.h.bf16 %v3398_v28  ;;  %v3399_v61 = vunpack.i.l.bf16 %v3398_v28 }
 0x25a   : > { %v2013_v40 = vpack.c.bf16 %v1992_v29, %v1991_v35  ;;  %v2289_v9 = vpack.c.bf16 %v2262_v37, %v2261_v62  ;;  %v3415_v43 = vunpack.i.h.bf16 %v3413_v15  ;;  %v3414_v52 = vunpack.i.l.bf16 %v3413_v15 }
 0x25b   : > { %v5187_v55 = vpop.permute.xlu0 %3402 }
 0x25c   : > { %2746 = vmatmul.msk.bf16.gmra.mxu1 %vm2039_vm13, %v2013_v40  ;;  %2756 = vmatmul.msk.bf16.gmra.mxu2 %vm1742_vm6, %v2289_v9  ;;  %v3404_v13 = vunpack.i.l.bf16 %v5187_v55  ;;  %v1830_v45 = vsel %vm1806_vm8, %v1797_v24, %v3415_v43  ;;  %v1829_v37 = vsel %vm1806_vm8, %v5041_v27, %v3414_v52  ;;  %v3405_v28 = vunpack.i.h.bf16 %v5187_v55 }
 0x25e   : > { %v3393_v12 = vpop.permute.xlu1 %3392  ;;  %v3433_v48 = vpop.permute.xlu2 %3432 }
 0x25f   : > { %v3395_v0 = vunpack.i.h.bf16 %v3393_v12  ;;  %v3394_v10 = vunpack.i.l.bf16 %v3393_v12  ;;  %v3435_v55 = vunpack.i.h.bf16 %v3433_v48  ;;  %v3434_v15 = vunpack.i.l.bf16 %v3433_v48 }
 0x260   : > { %v2126_v22 = vpop.f32.mrf.mxu1 }
 0x261   : > { %v2195_v47 = vmul.f32 %v4802_v20, %v2126_v22  ;;  %v1900_v17 = vsel %vm1871_vm9, %v1867_v14, %v3394_v10 }
 0x262   : > { %v1933_v44 = vsel %vm1904_vm10, %v1900_v17, %v3399_v61 }
 0x263   : > { %v3418_v18 = vpop.permute.xlu0 %3417  ;;  %v2231_v5 = vadd.f32 %v4830_v3, %v2195_v47  ;;  %v1966_v12 = vsel %vm1937_vm11, %v1933_v44, %v3404_v13  ;;  %v5593_v44 = vld [vmem:[#allocation19_spill] sm:$0xff] }
 0x264   : > { %v3420_v38 = vunpack.i.h.bf16 %v3418_v18  ;;  %v3419_v36 = vunpack.i.l.bf16 %v3418_v18 }
 0x265   : > { %v2263_v11 = vmax.f32 %v2231_v5, 0.0 }
 0x266   : > { %v3408_v16 = vpop.permute.xlu1 %3407  ;;  %v1861_v29 = vsel %vm437_vm0, %v1829_v37, %v3419_v36  ;;  %v1862_v40 = vsel %vm437_vm0, %v1830_v45, %v3420_v38  ;;  %v3465_v38 = vld [vmem:[%s3755_s28 + $0x8] sm:$0xff] }
 0x267   : > { %2749 = vmatmul.msk.bf16.gmra.mxu3 %vm2039_vm13, %v2016_v21  ;;  %v1901_v21 = vsel %vm1871_vm9, %v1868_v49, %v3395_v0  ;;  %v3410_v60 = vunpack.i.h.bf16 %v3408_v16  ;;  %v3409_v57 = vunpack.i.l.bf16 %v3408_v16  ;;  %v3438_v0 = vpop.permute.xlu2 %3437 }
 0x268   : > { %v2128_v4 = vpop.f32.mrf.mxu1  ;;  %v1934_v46 = vsel %vm1904_vm10, %v1901_v21, %v3400_v53  ;;  %v3440_v17 = vunpack.i.h.bf16 %v3438_v0  ;;  %v3439_v21 = vunpack.i.l.bf16 %v3438_v0 }
 0x269   : > { %v2196_v19 = vmul.f32 %v4802_v20, %v2128_v4  ;;  %v1967_v27 = vsel %vm1937_vm11, %v1934_v46, %v3405_v28  ;;  %v1999_v39 = vsel %vm1970_vm12, %v1966_v12, %v3409_v57 }
 0x26a   : > { %v2000_v56 = vsel %vm1970_vm12, %v1967_v27, %v3410_v60  ;;  %v1838_v46 = vsel %vm1806_vm8, %v5593_v44, %v3440_v17 }
 0x26b   : > { %v2232_v31 = vadd.f32 %v4830_v3, %v2196_v19  ;;  %v3428_v8 = vpop.permute.xlu0 %3427  ;;  %v2017_v7 = vpack.c.bf16 %v2000_v56, %v1999_v39  ;;  %v5292_v56 = vld [vmem:[%s5535_s6] ss:$0 sm:$0xff] }
 0x26c   : > { %v3430_v33 = vunpack.i.h.bf16 %v3428_v8  ;;  %v3429_v30 = vunpack.i.l.bf16 %v3428_v8 }
 0x26d   : > { %v2264_v50 = vmax.f32 %v2232_v31, 0.0  ;;  %v2362_v23 = vpop.f32.mrf.mxu2 }
 0x26e   : > { %v3423_v1 = vpop.permute.xlu1 %3422  ;;  %v2446_v35 = vmul.f32 %v5217_v26, %v2362_v23 }
 0x26f   : > { %v3425_v62 = vunpack.i.h.bf16 %v3423_v1  ;;  %v3424_v54 = vunpack.i.l.bf16 %v3423_v1  ;;  %v2290_v9 = vpack.c.bf16 %v2264_v50, %v2263_v11  ;;  %v5594_v11 = vld [vmem:[#allocation22_spill] sm:$0xff] }
 0x270   : > { %v2482_v63 = vadd.f32 %v5226_v59, %v2446_v35  ;;  %v1837_v60 = vsel %vm1806_vm8, %v5594_v11, %v3439_v21  ;;  %v3470_v11 = vld [vmem:[%s3755_s28 + $0x20] sm:$0xff] }
 0x271   : > { %v1894_v22 = vsel %vm1871_vm9, %v1861_v29, %v3424_v54  ;;  %v1895_v42 = vsel %vm1871_vm9, %v1862_v40, %v3425_v62  ;;  %v2131_v32 = vpop.f32.mrf.mxu1  ;;  %2757 = vmatmul.msk.bf16.gmra.mxu2 %vm1742_vm6, %v2290_v9  ;;  %v1524_v62 = vpop.permute.xlu2 %1523 }
 0x272   : > { %v2514_v34 = vadd.f32 %v3464_v41, %v2482_v63  ;;  %v1927_v18 = vsel %vm1904_vm10, %v1894_v22, %v3434_v15  ;;  %v1928_v6 = vsel %vm1904_vm10, %v1895_v42, %v3435_v55  ;;  %v2197_v10 = vmul.f32 %v4802_v20, %v2131_v32  ;;  %v5283_v42 = vld [vmem:[%s5534_s5] ss:$0 sm:$0xff] }
 0x273   : > { %v1960_v14 = vsel %vm1937_vm11, %v1927_v18, %v3429_v30  ;;  %v1961_v49 = vsel %vm1937_vm11, %v1928_v6, %v3430_v33  ;;  %v3443_v5 = vpop.permute.xlu0 %3442 }
 0x274   : > { %v2546_v47 = vmax.f32 %v2514_v34, 0.0  ;;  %v2233_v43 = vadd.f32 %v4830_v3, %v2197_v10  ;;  %v3445_v48 = vunpack.i.h.bf16 %v3443_v5  ;;  %v3444_v13 = vunpack.i.l.bf16 %v3443_v5  ;;  %v3468_v5 = vld [vmem:[%s3755_s28 + $0x10] sm:$0xff] }
 0x275   : > { %v2364_v25 = vpop.f32.mrf.mxu2 }
 0x276   : > { %v3448_v16 = vpop.permute.xlu1 %3447  ;;  %2578 = vst.msk [vmem:[%s5249_s15] sm:$0xff] %vm437_vm0, %v2546_v47  ;;  %v2447_v58 = vmul.f32 %v5217_v26, %v2364_v25  ;;  %v2265_v50 = vmax.f32 %v2233_v43, 0.0  ;;  %v1869_v54 = vsel %vm437_vm0, %v1837_v60, %v3444_v13  ;;  %v1870_v45 = vsel %vm437_vm0, %v1838_v46, %v3445_v48 }
 0x277   : > { %v3450_v2 = vunpack.i.h.bf16 %v3448_v16  ;;  %v3449_v51 = vunpack.i.l.bf16 %v3448_v16  ;;  %2750 = vmatmul.msk.bf16.gmra.mxu3 %vm2039_vm13, %v2017_v7 }
 0x278   : > { %v2483_v19 = vadd.f32 %v5226_v59, %v2447_v58 }
 0x279   : > { %v1993_v4 = vsel %vm1970_vm12, %v1960_v14, %v3449_v51  ;;  %v1994_v24 = vsel %vm1970_vm12, %v1961_v49, %v3450_v2  ;;  %v2133_v53 = vpop.f32.mrf.mxu1 }
 0x27a   : > { %v2014_v61 = vpack.c.bf16 %v1994_v24, %v1993_v4  ;;  %v2198_v52 = vmul.f32 %v4802_v20, %v2133_v53  ;;  %v2515_v36 = vadd.f32 %v3465_v38, %v2483_v19 }
 0x27b   : > { %v1617_v9 = vpop.permute.xlu0 %1616 }
 0x27c   : > { %2747 = vmatmul.msk.bf16.gmra.mxu1 %vm2039_vm13, %v2014_v61  ;;  %v2234_v31 = vadd.f32 %v4830_v3, %v2198_v52  ;;  %v2547_v1 = vmax.f32 %v2515_v36, 0.0  ;;  %v3469_v61 = vld [vmem:[%s3755_s28 + $0x18] sm:$0xff] }
 0x27e   : > { %v3453_v57 = vpop.permute.xlu1 %3452  ;;  %v2266_v8 = vmax.f32 %v2234_v31, 0.0  ;;  %2579 = vst.msk [vmem:[%s5249_s15 + $0x8] sm:$0xff] %vm437_vm0, %v2547_v1 }
 0x27f   : > { %v3455_v23 = vunpack.i.h.bf16 %v3453_v57  ;;  %v3454_v20 = vunpack.i.l.bf16 %v3453_v57 }
 0x280   : > { %v2291_v28 = vpack.c.bf16 %v2266_v8, %v2265_v50 }
 0x281   : > { %v1902_v3 = vsel %vm1871_vm9, %v1869_v54, %v3454_v20  ;;  %v1903_v37 = vsel %vm1871_vm9, %v1870_v45, %v3455_v23  ;;  %v2136_v35 = vpop.f32.mrf.mxu1 }
 0x282   : > { %v1935_v29 = vsel %vm1904_vm10, %v1902_v3, %v1524_v62  ;;  %v1936_v40 = vsel %vm1904_vm10, %v1903_v37, %v1524_v62  ;;  %2758 = vmatmul.msk.bf16.gmra.mxu2 %vm1742_vm6, %v2291_v28  ;;  %v2199_v32 = vmul.f32 %v5283_v42, %v2136_v35  ;;  %v3471_v3 = vld [vmem:[%s3755_s28 + $0x28] sm:$0xff] }
 0x283   : > { %v1968_v12 = vsel %vm1937_vm11, %v1935_v29, %v1617_v9  ;;  %v1969_v63 = vsel %vm1937_vm11, %v1936_v40, %v1617_v9  ;;  %v3472_v9 = vld [vmem:[%s3755_s28 + $0x30] sm:$0xff] }
 0x284   : > { %v2235_v41 = vadd.f32 %v5292_v56, %v2199_v32 }
 0x286   : > { %v1710_v22 = vpop.permute.xlu1 %1709  ;;  %v2267_v6 = vmax.f32 %v2235_v41, 0.0 }
 0x287   : > { %v2001_v27 = vsel %vm1970_vm12, %v1968_v12, %v1710_v22  ;;  %v2002_v55 = vsel %vm1970_vm12, %v1969_v63, %v1710_v22 }
 0x288   : > { %v2018_v15 = vpack.c.bf16 %v2002_v55, %v2001_v27  ;;  %v3473_v55 = vld [vmem:[%s3755_s28 + $0x38] sm:$0xff] }
 0x289   : > { %v2138_v39 = vpop.f32.mrf.mxu1 }
 0x28a   : > { %2751 = vmatmul.msk.bf16.gmra.mxu3 %vm2039_vm13, %v2018_v15  ;;  %v2200_v34 = vmul.f32 %v5283_v42, %v2138_v39 }
 0x28c   : > { %v2236_v18 = vadd.f32 %v5292_v56, %v2200_v34 }
 0x28e   : > { %v2268_v33 = vmax.f32 %v2236_v18, 0.0 }
 0x290   : > { %v2292_v30 = vpack.c.bf16 %v2268_v33, %v2267_v6 }
 0x292   : > { %2759 = vmatmul.msk.bf16.gmra.mxu2 %vm1742_vm6, %v2292_v30 }
 0x299   : > { %v2141_v47 = vpop.f32.mrf.mxu1 }
 0x29a   : > { %v2201_v16 = vmul.f32 %v5283_v42, %v2141_v47 }
 0x29c   : > { %v2237_v10 = vadd.f32 %v5292_v56, %v2201_v16 }
 0x29e   : > { %v2269_v14 = vmax.f32 %v2237_v10, 0.0  ;;  %v3474_v10 = vld [vmem:[%s3755_s28 + $0x40] sm:$0xff] }
 0x2a1   : > { %v2143_v7 = vpop.f32.mrf.mxu1 }
 0x2a2   : > { %v2367_v0 = vpop.f32.mrf.mxu2  ;;  %v2202_v25 = vmul.f32 %v5283_v42, %v2143_v7 }
 0x2a3   : > { %v2448_v2 = vmul.f32 %v5217_v26, %v2367_v0 }
 0x2a4   : > { %v2238_v51 = vadd.f32 %v5292_v56, %v2202_v25 }
 0x2a5   : > { %v2484_v58 = vadd.f32 %v5226_v59, %v2448_v2 }
 0x2a6   : > { %v2270_v49 = vmax.f32 %v2238_v51, 0.0 }
 0x2a7   : > { %v2516_v4 = vadd.f32 %v3468_v5, %v2484_v58 }
 0x2a8   : > { %v2293_v17 = vpack.c.bf16 %v2270_v49, %v2269_v14 }
 0x2a9   : > { %v2548_v24 = vmax.f32 %v2516_v4, 0.0 }
 0x2aa   : > { %v2369_v21 = vpop.f32.mrf.mxu2  ;;  %2760 = vmatmul.msk.bf16.gmra.mxu2 %vm1742_vm6, %v2293_v17 }
 0x2ab   : > { %2580 = vst.msk [vmem:[%s5249_s15 + $0x10] sm:$0xff] %vm437_vm0, %v2548_v24  ;;  %v2449_v19 = vmul.f32 %v5217_v26, %v2369_v21  ;;  %v3475_v21 = vld [vmem:[%s3755_s28 + $0x48] sm:$0xff] }
 0x2ad   : > { %v2485_v53 = vadd.f32 %v5226_v59, %v2449_v19 }
 0x2af   : > { %v2517_v43 = vadd.f32 %v3469_v61, %v2485_v53 }
 0x2b1   : > { %v2549_v52 = vmax.f32 %v2517_v43, 0.0  ;;  %v2146_v48 = vpop.f32.mrf.mxu1 }
 0x2b2   : > { %v2203_v38 = vmul.f32 %v5283_v42, %v2146_v48 }
 0x2b3   : > { %2581 = vst.msk [vmem:[%s5249_s15 + $0x18] sm:$0xff] %vm437_vm0, %v2549_v52 }
 0x2b4   : > { %v2372_v13 = vpop.f32.mrf.mxu2  ;;  %v2239_v46 = vadd.f32 %v5292_v56, %v2203_v38 }
 0x2b5   : > { %v2450_v36 = vmul.f32 %v5217_v26, %v2372_v13 }
 0x2b6   : > { %v2271_v23 = vmax.f32 %v2239_v46, 0.0 }
 0x2b7   : > { %v2486_v31 = vadd.f32 %v5226_v59, %v2450_v36 }
 0x2b9   : > { %v2148_v44 = vpop.f32.mrf.mxu1  ;;  %v2518_v60 = vadd.f32 %v3470_v11, %v2486_v31 }
 0x2ba   : > { %v2204_v1 = vmul.f32 %v5283_v42, %v2148_v44 }
 0x2bb   : > { %v2550_v57 = vmax.f32 %v2518_v60, 0.0 }
 0x2bc   : > { %v2240_v50 = vadd.f32 %v5292_v56, %v2204_v1  ;;  %v2374_v8 = vpop.f32.mrf.mxu2  ;;  %v3476_v1 = vld [vmem:[%s3755_s28 + $0x50] sm:$0xff] }
 0x2bd   : > { %2582 = vst.msk [vmem:[%s5249_s15 + $0x20] sm:$0xff] %vm437_vm0, %v2550_v57  ;;  %v2451_v62 = vmul.f32 %v5217_v26, %v2374_v8 }
 0x2be   : > { %v2272_v20 = vmax.f32 %v2240_v50, 0.0 }
 0x2bf   : > { %v2487_v54 = vadd.f32 %v5226_v59, %v2451_v62 }
 0x2c0   : > { %v2294_v45 = vpack.c.bf16 %v2272_v20, %v2271_v23 }
 0x2c1   : > { %v2519_v37 = vadd.f32 %v3471_v3, %v2487_v54 }
 0x2c2   : > { %2761 = vmatmul.msk.bf16.gmra.mxu2 %vm1742_vm6, %v2294_v45 }
 0x2c3   : > { %v2551_v28 = vmax.f32 %v2519_v37, 0.0 }
 0x2c5   : > { %v2377_v35 = vpop.f32.mrf.mxu2  ;;  %2583 = vst.msk [vmem:[%s5249_s15 + $0x28] sm:$0xff] %vm437_vm0, %v2551_v28 }
 0x2c6   : > { %v2452_v29 = vmul.f32 %v5217_v26, %v2377_v35  ;;  %v3477_v35 = vld [vmem:[%s3755_s28 + $0x58] sm:$0xff] }
 0x2c8   : > { %v2488_v40 = vadd.f32 %v5226_v59, %v2452_v29 }
 0x2ca   : > { %v2520_v12 = vadd.f32 %v3472_v9, %v2488_v40 }
 0x2cc   : > { %v2552_v63 = vmax.f32 %v2520_v12, 0.0 }
 0x2cd   : > { %v2379_v22 = vpop.f32.mrf.mxu2 }
 0x2ce   : > { %2584 = vst.msk [vmem:[%s5249_s15 + $0x30] sm:$0xff] %vm437_vm0, %v2552_v63  ;;  %v2453_v32 = vmul.f32 %v5217_v26, %v2379_v22 }
 0x2d0   : > { %v2489_v27 = vadd.f32 %v5226_v59, %v2453_v32 }
 0x2d2   : > { %v2521_v15 = vadd.f32 %v3473_v55, %v2489_v27 }
 0x2d4   : > { %v2553_v39 = vmax.f32 %v2521_v15, 0.0 }
 0x2d6   : > { %2585 = vst.msk [vmem:[%s5249_s15 + $0x38] sm:$0xff] %vm437_vm0, %v2553_v39 }
 0x2d9   : > { %v2151_v41 = vpop.f32.mrf.mxu1 }
 0x2da   : > { %v5338_v34 = vpop.f32.mrf.mxu3  ;;  %v2205_v18 = vmul.f32 %v5283_v42, %v2151_v41 }
 0x2dc   : > { %v2241_v47 = vadd.f32 %v5292_v56, %v2205_v18 }
 0x2de   : > { %v2273_v51 = vmax.f32 %v2241_v47, 0.0  ;;  %v3478_v47 = vld [vmem:[%s3755_s28 + $0x60] sm:$0xff] }
 0x2df   : > { %v2382_v6 = vpop.f32.mrf.mxu2 }
 0x2e0   : > { %v2454_v33 = vmul.f32 %v5217_v26, %v2382_v6 }
 0x2e1   : > { %v2153_v30 = vpop.f32.mrf.mxu1 }
 0x2e2   : > { %v2490_v16 = vadd.f32 %v5226_v59, %v2454_v33  ;;  %v2206_v7 = vmul.f32 %v5283_v42, %v2153_v30  ;;  %v5345_v0 = vpop.f32.mrf.mxu3 }
 0x2e4   : > { %v2522_v25 = vadd.f32 %v3474_v10, %v2490_v16  ;;  %v2242_v2 = vadd.f32 %v5292_v56, %v2206_v7  ;;  %v2210_v7 = vmul.f32 %v5283_v42, %v5345_v0 }
 0x2e6   : > { %v2554_v58 = vmax.f32 %v2522_v25, 0.0  ;;  %v2274_v14 = vmax.f32 %v2242_v2, 0.0  ;;  %v2209_v2 = vmul.f32 %v5283_v42, %v5338_v34 }
 0x2e7   : > { %v2384_v49 = vpop.f32.mrf.mxu2 }
 0x2e8   : > { %2586 = vst.msk [vmem:[%s5249_s15 + $0x40] sm:$0xff] %vm437_vm0, %v2554_v58  ;;  %v2455_v5 = vmul.f32 %v5217_v26, %v2384_v49  ;;  %v2295_v4 = vpack.c.bf16 %v2274_v14, %v2273_v51  ;;  %v2246_v14 = vadd.f32 %v5292_v56, %v2210_v7  ;;  %v3486_v7 = vld [vmem:[%s3755_s28 + $0xa0] sm:$0xff] }
 0x2ea   : > { %v2491_v24 = vadd.f32 %v5226_v59, %v2455_v5  ;;  %2762 = vmatmul.msk.bf16.gmra.mxu2 %vm1742_vm6, %v2295_v4  ;;  %v2166_v17 = vpop.f32.mrf.mxu3  ;;  %v2245_v5 = vadd.f32 %v5292_v56, %v2209_v2  ;;  %v3479_v4 = vld [vmem:[%s3755_s28 + $0x68] sm:$0xff] }
 0x2eb   : > { %v2211_v61 = vmul.f32 %v5283_v42, %v2166_v17  ;;  %v2278_v17 = vmax.f32 %v2246_v14, 0.0  ;;  %v3487_v14 = vld [vmem:[%s3755_s28 + $0xa8] sm:$0xff] }
 0x2ec   : > { %v2523_v19 = vadd.f32 %v3475_v21, %v2491_v24 }
 0x2ed   : > { %v2247_v52 = vadd.f32 %v5292_v56, %v2211_v61 }
 0x2ee   : > { %v2555_v53 = vmax.f32 %v2523_v19, 0.0  ;;  %v2277_v19 = vmax.f32 %v2245_v5, 0.0 }
 0x2ef   : > { %v2279_v31 = vmax.f32 %v2247_v52, 0.0 }
 0x2f0   : > { %2587 = vst.msk [vmem:[%s5249_s15 + $0x48] sm:$0xff] %vm437_vm0, %v2555_v53 }
 0x2f2   : > { %v2168_v43 = vpop.f32.mrf.mxu3 }
 0x2f3   : > { %v2212_v48 = vmul.f32 %v5283_v42, %v2168_v43 }
 0x2f4   : > { %v2387_v38 = vpop.f32.mrf.mxu2 }
 0x2f5   : > { %v2248_v13 = vadd.f32 %v5292_v56, %v2212_v48  ;;  %v2456_v36 = vmul.f32 %v5217_v26, %v2387_v38  ;;  %v2297_v48 = vpack.c.bf16 %v2278_v17, %v2277_v19  ;;  %v3488_v17 = vld [vmem:[%s3755_s28 + $0xd0] sm:$0xff] }
 0x2f7   : > { %v2280_v44 = vmax.f32 %v2248_v13, 0.0  ;;  %v2492_v46 = vadd.f32 %v5226_v59, %v2456_v36 }
 0x2f9   : > { %v2156_v11 = vpop.f32.mrf.mxu1  ;;  %v2298_v60 = vpack.c.bf16 %v2280_v44, %v2279_v31  ;;  %v2524_v57 = vadd.f32 %v3476_v1, %v2492_v46  ;;  %v3480_v44 = vld [vmem:[%s3755_s28 + $0x70] sm:$0xff] }
 0x2fa   : > { %v2171_v50 = vpop.f32.mrf.mxu3  ;;  %v2207_v23 = vmul.f32 %v5283_v42, %v2156_v11 }
 0x2fb   : > { %2765 = vmatmul.msk.bf16.vlgmr.msra.gmra.mxu3 %vm1742_vm6, %v2298_v60  ;;  %v2556_v8 = vmax.f32 %v2524_v57, 0.0  ;;  %v2213_v54 = vmul.f32 %v5283_v42, %v2171_v50  ;;  %v3481_v57 = vld [vmem:[%s3755_s28 + $0x78] sm:$0xff] }
 0x2fc   : > { %v2389_v20 = vpop.f32.mrf.mxu2  ;;  %v2243_v37 = vadd.f32 %v5292_v56, %v2207_v23 }
 0x2fd   : > { %2588 = vst.msk [vmem:[%s5249_s15 + $0x50] sm:$0xff] %vm437_vm0, %v2556_v8  ;;  %v2457_v62 = vmul.f32 %v5217_v26, %v2389_v20  ;;  %v2249_v9 = vadd.f32 %v5292_v56, %v2213_v54  ;;  %v3482_v54 = vld [vmem:[%s3755_s28 + $0x80] sm:$0xff] }
 0x2fe   : > { %v2275_v32 = vmax.f32 %v2243_v37, 0.0 }
 0x2ff   : > { %v2493_v45 = vadd.f32 %v5226_v59, %v2457_v62  ;;  %v2281_v41 = vmax.f32 %v2249_v9, 0.0 }
 0x301   : > { %v2158_v3 = vpop.f32.mrf.mxu1  ;;  %v2525_v29 = vadd.f32 %v3477_v35, %v2493_v45 }
 0x302   : > { %v2208_v28 = vmul.f32 %v5283_v42, %v2158_v3  ;;  %v2173_v40 = vpop.f32.mrf.mxu3 }
 0x303   : > { %v2214_v63 = vmul.f32 %v5283_v42, %v2173_v40  ;;  %v2557_v22 = vmax.f32 %v2525_v29, 0.0  ;;  %v3483_v29 = vld [vmem:[%s3755_s28 + $0x88] sm:$0xff] }
 0x304   : > { %v2244_v12 = vadd.f32 %v5292_v56, %v2208_v28 }
 0x305   : > { %v2250_v55 = vadd.f32 %v5292_v56, %v2214_v63  ;;  %v2392_v15 = vpop.f32.mrf.mxu2  ;;  %2589 = vst.msk [vmem:[%s5249_s15 + $0x58] sm:$0xff] %vm437_vm0, %v2557_v22 }
 0x306   : > { %v2276_v27 = vmax.f32 %v2244_v12, 0.0  ;;  %v2458_v39 = vmul.f32 %v5217_v26, %v2392_v15 }
 0x307   : > { %v2282_v18 = vmax.f32 %v2250_v55, 0.0 }
 0x308   : > { %v2296_v6 = vpack.c.bf16 %v2276_v27, %v2275_v32  ;;  %v2494_v33 = vadd.f32 %v5226_v59, %v2458_v39  ;;  %v3484_v32 = vld [vmem:[%s3755_s28 + $0x90] sm:$0xff] }
 0x309   : > { %v2299_v30 = vpack.c.bf16 %v2282_v18, %v2281_v41  ;;  %v3485_v18 = vld [vmem:[%s3755_s28 + $0x98] sm:$0xff] }
 0x30a   : > { %2763 = vmatmul.msk.bf16.gmra.mxu2 %vm1742_vm6, %v2296_v6  ;;  %v2526_v16 = vadd.f32 %v3478_v47, %v2494_v33 }
 0x30b   : > { %2766 = vmatmul.msk.bf16.gmra.mxu3 %vm1742_vm6, %v2299_v30 }
 0x30c   : > { %v2558_v10 = vmax.f32 %v2526_v16, 0.0 }
 0x30d   : > { %v2176_v25 = vpop.f32.mrf.mxu3  ;;  %v2394_v51 = vpop.f32.mrf.mxu2 }
 0x30e   : > { %2590 = vst.msk [vmem:[%s5249_s15 + $0x60] sm:$0xff] %vm437_vm0, %v2558_v10  ;;  %v2459_v58 = vmul.f32 %v5217_v26, %v2394_v51  ;;  %v2215_v0 = vmul.f32 %v5283_v42, %v2176_v25 }
 0x310   : > { %v2495_v49 = vadd.f32 %v5226_v59, %v2459_v58  ;;  %v2251_v53 = vadd.f32 %v5292_v56, %v2215_v0 }
 0x312   : > { %v2527_v24 = vadd.f32 %v3479_v4, %v2495_v49  ;;  %v2283_v36 = vmax.f32 %v2251_v53, 0.0 }
 0x314   : > { %v2559_v21 = vmax.f32 %v2527_v24, 0.0 }
 0x315   : > { %v2178_v34 = vpop.f32.mrf.mxu3  ;;  %v2397_v43 = vpop.f32.mrf.mxu2 }
 0x316   : > { %v2216_v61 = vmul.f32 %v5283_v42, %v2178_v34  ;;  %2591 = vst.msk [vmem:[%s5249_s15 + $0x68] sm:$0xff] %vm437_vm0, %v2559_v21  ;;  %v2460_v52 = vmul.f32 %v5217_v26, %v2397_v43  ;;  %v3489_v43 = vld [vmem:[%s3755_s28 + $0xd8] sm:$0xff] }
 0x318   : > { %v2252_v13 = vadd.f32 %v5292_v56, %v2216_v61  ;;  %v2496_v38 = vadd.f32 %v5226_v59, %v2460_v52 }
 0x31a   : > { %v2284_v31 = vmax.f32 %v2252_v13, 0.0  ;;  %2764 = vmatmul.msk.bf16.gmra.mxu2 %vm1742_vm6, %v2297_v48  ;;  %v2528_v42 = vadd.f32 %v3480_v44, %v2496_v38 }
 0x31c   : > { %v2300_v46 = vpack.c.bf16 %v2284_v31, %v2283_v36  ;;  %v2560_v11 = vmax.f32 %v2528_v42, 0.0  ;;  %v3490_v42 = vld [vmem:[%s3755_s28 + $0xb0] sm:$0xff] }
 0x31d   : > { %v2399_v60 = vpop.f32.mrf.mxu2 }
 0x31e   : > { %2767 = vmatmul.msk.bf16.gmra.mxu3 %vm1742_vm6, %v2300_v46  ;;  %2592 = vst.msk [vmem:[%s5249_s15 + $0x70] sm:$0xff] %vm437_vm0, %v2560_v11  ;;  %v2461_v56 = vmul.f32 %v5217_v26, %v2399_v60 }
 0x320   : > { %v2497_v1 = vadd.f32 %v5226_v59, %v2461_v56  ;;  %v3491_v56 = vld [vmem:[%s3755_s28 + $0xe0] sm:$0xff] }
 0x322   : > { %v2529_v50 = vadd.f32 %v3481_v57, %v2497_v1 }
 0x324   : > { %v2561_v8 = vmax.f32 %v2529_v50, 0.0 }
 0x326   : > { %2593 = vst.msk [vmem:[%s5249_s15 + $0x78] sm:$0xff] %vm437_vm0, %v2561_v8 }
 0x32d   : > { %v2402_v23 = vpop.f32.mrf.mxu2 }
 0x32e   : > { %v2462_v20 = vmul.f32 %v5217_v26, %v2402_v23 }
 0x330   : > { %v2498_v62 = vadd.f32 %v5226_v59, %v2462_v20 }
 0x332   : > { %v2530_v45 = vadd.f32 %v3482_v54, %v2498_v62  ;;  %v3492_v54 = vld [vmem:[%s3755_s28 + $0xb8] sm:$0xff] }
 0x334   : > { %v2562_v3 = vmax.f32 %v2530_v45, 0.0 }
 0x335   : > { %v2404_v37 = vpop.f32.mrf.mxu2 }
 0x336   : > { %2594 = vst.msk [vmem:[%s5249_s15 + $0x80] sm:$0xff] %vm437_vm0, %v2562_v3  ;;  %v2463_v28 = vmul.f32 %v5217_v26, %v2404_v37 }
 0x338   : > { %v2499_v35 = vadd.f32 %v5226_v59, %v2463_v28  ;;  %v3493_v28 = vld [vmem:[%s3755_s28 + $0xe8] sm:$0xff] }
 0x33a   : > { %v2531_v40 = vadd.f32 %v3483_v29, %v2499_v35 }
 0x33c   : > { %v2563_v9 = vmax.f32 %v2531_v40, 0.0 }
 0x33e   : > { %2595 = vst.msk [vmem:[%s5249_s15 + $0x88] sm:$0xff] %vm437_vm0, %v2563_v9 }
 0x345   : > { %v2407_v12 = vpop.f32.mrf.mxu2 }
 0x346   : > { %v2464_v63 = vmul.f32 %v5217_v26, %v2407_v12 }
 0x348   : > { %v2500_v22 = vadd.f32 %v5226_v59, %v2464_v63 }
 0x34a   : > { %v2532_v27 = vadd.f32 %v3484_v32, %v2500_v22  ;;  %v3494_v22 = vld [vmem:[%s3755_s28 + $0xc0] sm:$0xff] }
 0x34c   : > { %v2564_v55 = vmax.f32 %v2532_v27, 0.0 }
 0x34d   : > { %v2409_v15 = vpop.f32.mrf.mxu2 }
 0x34e   : > { %2596 = vst.msk [vmem:[%s5249_s15 + $0x90] sm:$0xff] %vm437_vm0, %v2564_v55  ;;  %v2465_v39 = vmul.f32 %v5217_v26, %v2409_v15 }
 0x350   : > { %v2501_v41 = vadd.f32 %v5226_v59, %v2465_v39 }
 0x352   : > { %v2533_v6 = vadd.f32 %v3485_v18, %v2501_v41  ;;  %v3495_v41 = vld [vmem:[%s3755_s28 + $0xf0] sm:$0xff] }
 0x354   : > { %v2565_v33 = vmax.f32 %v2533_v6, 0.0 }
 0x356   : > { %2597 = vst.msk [vmem:[%s5249_s15 + $0x98] sm:$0xff] %vm437_vm0, %v2565_v33 }
 0x36d   : > { %v2412_v30 = vpop.f32.mrf.mxu2 }
 0x36e   : > { %v2466_v47 = vmul.f32 %v5217_v26, %v2412_v30 }
 0x370   : > { %v2502_v16 = vadd.f32 %v5226_v59, %v2466_v47 }
 0x372   : > { %v2534_v10 = vadd.f32 %v3486_v7, %v2502_v16  ;;  %v3496_v16 = vld [vmem:[%s3755_s28 + $0xc8] sm:$0xff] }
 0x374   : > { %v2566_v25 = vmax.f32 %v2534_v10, 0.0 }
 0x375   : > { %v2414_v2 = vpop.f32.mrf.mxu2 }
 0x376   : > { %2598 = vst.msk [vmem:[%s5249_s15 + $0xa0] sm:$0xff] %vm437_vm0, %v2566_v25  ;;  %v2467_v51 = vmul.f32 %v5217_v26, %v2414_v2 }
 0x378   : > { %v2503_v58 = vadd.f32 %v5226_v59, %v2467_v51  ;;  %v3497_v51 = vld [vmem:[%s3755_s28 + $0xf8] sm:$0xff] }
 0x37a   : > { %v2535_v49 = vadd.f32 %v3487_v14, %v2503_v58 }
 0x37c   : > { %v2567_v5 = vmax.f32 %v2535_v49, 0.0 }
 0x37e   : > { %2599 = vst.msk [vmem:[%s5249_s15 + $0xa8] sm:$0xff] %vm437_vm0, %v2567_v5  ;;  %v2427_v0 = vpop.f32.mrf.mxu3 }
 0x37f   : > { %v2472_v4 = vmul.f32 %v5217_v26, %v2427_v0 }
 0x381   : > { %v2508_v24 = vadd.f32 %v5226_v59, %v2472_v4 }
 0x383   : > { %v2540_v21 = vadd.f32 %v3488_v17, %v2508_v24 }
 0x385   : > { %v2572_v34 = vmax.f32 %v2540_v21, 0.0 }
 0x386   : > { %v2429_v19 = vpop.f32.mrf.mxu3 }
 0x387   : > { %2604 = vst.msk [vmem:[%s5249_s15 + $0xd0] sm:$0xff] %vm437_vm0, %v2572_v34  ;;  %v2473_v53 = vmul.f32 %v5217_v26, %v2429_v19 }
 0x389   : > { %v2509_v61 = vadd.f32 %v5226_v59, %v2473_v53 }
 0x38b   : > { %v2541_v52 = vadd.f32 %v3489_v43, %v2509_v61 }
 0x38d   : > { %v2417_v48 = vpop.f32.mrf.mxu2  ;;  %v2573_v13 = vmax.f32 %v2541_v52, 0.0 }
 0x38e   : > { %v2468_v38 = vmul.f32 %v5217_v26, %v2417_v48  ;;  %v2432_v36 = vpop.f32.mrf.mxu3 }
 0x38f   : > { %2605 = vst.msk [vmem:[%s5249_s15 + $0xd8] sm:$0xff] %vm437_vm0, %v2573_v13  ;;  %v2474_v44 = vmul.f32 %v5217_v26, %v2432_v36 }
 0x390   : > { %v2504_v31 = vadd.f32 %v5226_v59, %v2468_v38 }
 0x391   : > { %v2510_v11 = vadd.f32 %v5226_v59, %v2474_v44 }
 0x392   : > { %v2536_v46 = vadd.f32 %v3490_v42, %v2504_v31 }
 0x393   : > { %v2542_v1 = vadd.f32 %v3491_v56, %v2510_v11 }
 0x394   : > { %v2568_v60 = vmax.f32 %v2536_v46, 0.0 }
 0x395   : > { %v2419_v57 = vpop.f32.mrf.mxu2  ;;  %v2574_v50 = vmax.f32 %v2542_v1, 0.0 }
 0x396   : > { %2600 = vst.msk [vmem:[%s5249_s15 + $0xb0] sm:$0xff] %vm437_vm0, %v2568_v60  ;;  %v2469_v8 = vmul.f32 %v5217_v26, %v2419_v57  ;;  %v2434_v23 = vpop.f32.mrf.mxu3 }
 0x397   : > { %2606 = vst.msk [vmem:[%s5249_s15 + $0xe0] sm:$0xff] %vm437_vm0, %v2574_v50  ;;  %v2475_v62 = vmul.f32 %v5217_v26, %v2434_v23 }
 0x398   : > { %v2505_v20 = vadd.f32 %v5226_v59, %v2469_v8 }
 0x399   : > { %v2511_v3 = vadd.f32 %v5226_v59, %v2475_v62 }
 0x39a   : > { %v2537_v45 = vadd.f32 %v3492_v54, %v2505_v20 }
 0x39b   : > { %v2543_v35 = vadd.f32 %v3493_v28, %v2511_v3 }
 0x39c   : > { %v2569_v37 = vmax.f32 %v2537_v45, 0.0 }
 0x39d   : > { %v2422_v29 = vpop.f32.mrf.mxu2  ;;  %v2575_v40 = vmax.f32 %v2543_v35, 0.0 }
 0x39e   : > { %2601 = vst.msk [vmem:[%s5249_s15 + $0xb8] sm:$0xff] %vm437_vm0, %v2569_v37  ;;  %v2470_v9 = vmul.f32 %v5217_v26, %v2422_v29 }
 0x39f   : > { %2607 = vst.msk [vmem:[%s5249_s15 + $0xe8] sm:$0xff] %vm437_vm0, %v2575_v40 }
 0x3a0   : > { %v2506_v12 = vadd.f32 %v5226_v59, %v2470_v9 }
 0x3a1   : > { %v2437_v63 = vpop.f32.mrf.mxu3 }
 0x3a2   : > { %v2538_v32 = vadd.f32 %v3494_v22, %v2506_v12  ;;  %v2476_v27 = vmul.f32 %v5217_v26, %v2437_v63 }
 0x3a4   : > { %v2570_v55 = vmax.f32 %v2538_v32, 0.0  ;;  %v2512_v15 = vadd.f32 %v5226_v59, %v2476_v27 }
 0x3a5   : > { %v2424_v39 = vpop.f32.mrf.mxu2 }
 0x3a6   : > { %2602 = vst.msk [vmem:[%s5249_s15 + $0xc0] sm:$0xff] %vm437_vm0, %v2570_v55  ;;  %v2544_v18 = vadd.f32 %v3495_v41, %v2512_v15  ;;  %v2471_v6 = vmul.f32 %v5217_v26, %v2424_v39 }
 0x3a8   : > { %v2576_v33 = vmax.f32 %v2544_v18, 0.0  ;;  %v2507_v30 = vadd.f32 %v5226_v59, %v2471_v6 }
 0x3a9   : > { %v2439_v47 = vpop.f32.mrf.mxu3 }
 0x3aa   : > { %2608 = vst.msk [vmem:[%s5249_s15 + $0xf0] sm:$0xff] %vm437_vm0, %v2576_v33  ;;  %v2539_v7 = vadd.f32 %v3496_v16, %v2507_v30  ;;  %v2477_v10 = vmul.f32 %v5217_v26, %v2439_v47 }
 0x3ac   : > { %v2571_v25 = vmax.f32 %v2539_v7, 0.0  ;;  %v2513_v2 = vadd.f32 %v5226_v59, %v2477_v10 }
 0x3ae   : > { %2603 = vst.msk [vmem:[%s5249_s15 + $0xc8] sm:$0xff] %vm437_vm0, %v2571_v25  ;;  %v2545_v58 = vadd.f32 %v3497_v51, %v2513_v2 }
 0x3b0   : > { %v2577_v14 = vmax.f32 %v2545_v58, 0.0 }
 0x3b2   : > { %2609 = vst.msk [vmem:[%s5249_s15 + $0xf8] sm:$0xff] %vm437_vm0, %v2577_v14 }
 0x3b3   : > { %3555 = shalt.err (!%p3552_p4)
}
 0x3b4   : > { %s3607_s18 = smov 128  }
 0x3b5   : > { %2785 = dma.vmem_to_hbm [thread:$0]  (%p3713_p11), %s2624_s17, 4096, %s2626_s27, %s2611_s12, %s3607_s18, %s3607_s18, %s3601_s11  }
 0x3b6 PF: > { %s2640_s20 = sand.u32 1, %s3582_s13   ;;  %p5596_p7 = scmp.ge.s32.totalorder %s3594_s16, 2 }
 0x3b7   : > { %s2641_s21 = scalar_lea.sflag [#allocation4], %s2640_s20 }
 0x3b8   : > { %p2792_p5 = pnand %p5596_p7, %p3717_p12 }
 0x3ba   : > { %p2793_p8 = pneg %p2792_p5 }
 0x3bc   : > { %3577 = dma.done.wait (%p2793_p8), %s2641_s21, 4096  }
 0x3bd   : > { %3579 = vsyncadd (%p2793_p8), %s2641_s21, 4294963200  ;;  %s5597_s16 = sld [smem:[#allocation9_spill]]  ;;  %s5600_s13 = smov %s3586_s14 }
 0x3be   : > { %s5598_s30 = sld [smem:[#allocation8_spill]] }
 0x3bf   : > { %s5599_s15 = sld [smem:[#allocation10_spill]] }
 0x3c3   : > { %p23_p10 = scmp.ge.s32.totalorder %s5597_s16, 4  }
 0x3c4   : > { %s5601_s14 = smov %s5598_s30 }
 0x3c5   :  { %25 = sbr.rel (!%p23_p10) target bundleno = 5 (0x5), region = 105 }
 0x3ca   :  { %2647 = vsyncpa [#allocation3], 1 }
 0x3cb   :  { %2649 = vsyncpa [#allocation3 + $0x1], 1 }
 0x3cc   :  { %2650 = vsyncpa [#allocation4], 1 }
 0x3cd   :  { %2652 = vsyncpa [#allocation4 + $0x1], 1 }

</bundles_post_ra>
